<compile_context>
chip_gen: v6e
topology: v6e:2x2x1
jax: 0.10.0
libtpu: 0.0.40
codegen_flags: <defaults>
</compile_context>

<pallas_src>
import functools
import math

import jax
import jax.numpy as jnp
import numpy as np
from jax import lax
from jax.experimental import pallas as pl
from jax.experimental.pallas import tpu as pltpu

# ----------------------------- model config --------------------------------
INPUT_SIZE = 4
HIDDEN_SIZE = 32
VF_HIDDEN_SIZE = 128
SCALE = 0.1
BATCH = 2
SEQ_LEN = 8

LANE = 128      # TPU lane width: packed [hidden | input | zeros] slab width
SUBLANE = 8

_INV_SQRT2 = 1.0 / math.sqrt(2.0)


def _gelu_exact(x):
    # PyTorch nn.GELU() default (exact, erf-based) -> keeps module semantics.
    # TODO(synk): switch to tanh-approx GELU (EUP-routed) if parity with
    # PyTorch's exact erf GELU is not required and VALU becomes the bottleneck.
    return 0.5 * x * (1.0 + lax.erf(x * _INV_SQRT2))


def _round_up(a, m):
    return ((a + m - 1) // m) * m


# ------------------------------ Pallas kernel -------------------------------
def mlp_rnn_seq_kernel(x_ref, h0_ref, w1_ref, b1_ref, w2_ref, b2_ref,
                       w3_ref, b3_ref, out_ref, h_ref, *, scale, tc):
    tchunk = pl.program_id(1)

    # First time chunk of each batch tile: load the lane-padded initial hidden
    # state (cols >= H are zero).
    @pl.when(tchunk == 0)
    def _():
        h_ref[...] = h0_ref[...]

    bp = h_ref.shape[0]
    vf = w2_ref.shape[0]

    # Resident weights read once per chunk; bias broadcasts hoisted out of the
    # time loop (JAX does not CSE broadcast_in_dim across loop iterations).
    w1 = w1_ref[...]
    w2 = w2_ref[...]
    w3 = w3_ref[...]
    b1b = jnp.broadcast_to(b1_ref[...], (bp, vf))
    b2b = jnp.broadcast_to(b2_ref[...], (bp, vf))
    b3b = jnp.broadcast_to(b3_ref[...], (bp, LANE))

    def step(t, h):
        # Packed MLP input: hidden slab and input slab occupy disjoint lane
        # ranges, so [h | x | 0] is a single full-width add (no concat, no
        # partial stores).
        xh = h + x_ref[t].astype(jnp.float32)                      # (BP, 128)

        # Layer 1: [h | x | 0] @ [W1h ; W1x ; 0]  ==  concat([h, x]) @ W1^T
        z1 = jnp.dot(xh.astype(jnp.bfloat16), w1,
                     preferred_element_type=jnp.float32) + b1b
        a1 = _gelu_exact(z1)

        # Layer 2: VF -> VF
        z2 = jnp.dot(a1.astype(jnp.bfloat16), w2,
                     preferred_element_type=jnp.float32) + b2b
        a2 = _gelu_exact(z2)

        # Layer 3, zero-padded to 128 output lanes: columns >= H of z3 are
        # exactly zero, so the full-width update keeps the hidden-slab
        # invariant (lanes >= H of h stay exactly zero).
        z3 = jnp.dot(a2.astype(jnp.bfloat16), w3,
                     preferred_element_type=jnp.float32) + b3b

        h_new = h + scale * z3                                     # (BP, 128)
        out_ref[t] = h_new.astype(out_ref.dtype)                   # lane-dense
        return h_new

    # Whole time chunk per grid step: amortizes the ~0.35 us/grid-step overhead
    # (which previously dwarfed three 8-row matmuls) and removes per-step
    # hidden-state VMEM round trips; h is carried as a local f32 value.
    h_ref[...] = lax.fori_loop(0, tc, step, h_ref[...], unroll=True)


# ------------------------------- wrappers ------------------------------------
def mlp_rnn_cell_seq(x_seq, h0, kernel_params, *, scale=SCALE,
                     time_chunk=None, batch_tile=None):
    """Apply the cell over a whole sequence in one fused kernel.

    x_seq: (T, B, I) f32, h0: (B, H) f32  ->  all hidden states (T, B, H) f32.
    """
    T, B, I = x_seq.shape
    H = h0.shape[1]
    w1p, b1, w2, b2, w3p, b3p = kernel_params
    VF = w2.shape[0]
    assert H + I <= LANE, "packed [h|x] state must fit one 128-lane slab"

    # Batch tile: 8-sublane minimum; for production batches size it to fill
    # MXU rows (~128 on v5e, ~256 on v6e/v7x).  At the demo size this is 8.
    bp_tile = batch_tile or min(256, _round_up(B, SUBLANE))
    bp_total = _round_up(max(B, bp_tile), bp_tile)
    nb = bp_total // bp_tile

    # Time chunk: at T=8 the whole recurrence runs in one grid step.
    tc = time_chunk or min(T, 8)
    t_pad = _round_up(T, tc)
    nt = t_pad // tc

    # Pad batch to the tile; pack input/hidden into lane-dense 128-wide slabs.
    # x is streamed in bf16: it only reaches the layer-1 matmul through a bf16
    # cast and occupies lanes disjoint from the f32 hidden state, so this is
    # bit-identical to f32 streaming while halving the input DMA.
    x_pad = (jnp.zeros((t_pad, bp_total, LANE), jnp.bfloat16)
             .at[:T, :B, H:H + I].set(x_seq.astype(jnp.bfloat16)))
    h0_pad = jnp.zeros((bp_total, LANE), jnp.float32).at[:B, :H].set(h0)

    wmap = lambda b, t: (0, 0)  # resident-in-VMEM weights: block never changes
    out = pl.pallas_call(
        functools.partial(mlp_rnn_seq_kernel, scale=scale, tc=tc),
        out_shape=jax.ShapeDtypeStruct((t_pad, bp_total, LANE), jnp.float32),
        grid_spec=pltpu.PrefetchScalarGridSpec(
            num_scalar_prefetch=0,
            grid=(nb, nt),
            in_specs=[
                pl.BlockSpec((tc, bp_tile, LANE), lambda b, t: (t, b, 0)),  # x
                pl.BlockSpec((bp_tile, LANE), lambda b, t: (b, 0)),         # h0
                pl.BlockSpec((LANE, VF), wmap),                    # W1 packed
                pl.BlockSpec((1, VF), wmap),                       # b1
                pl.BlockSpec((VF, VF), wmap),                      # W2
                pl.BlockSpec((1, VF), wmap),                       # b2
                pl.BlockSpec((VF, LANE), wmap),                    # W3 padded
                pl.BlockSpec((1, LANE), wmap),                     # b3 padded
            ],
            out_specs=pl.BlockSpec((tc, bp_tile, LANE),
                                   lambda b, t: (t, b, 0)),
            scratch_shapes=[pltpu.VMEM((bp_tile, LANE), jnp.float32)],  # carry
        ),
        # Batch tiles are independent (parallel -> both v7x TensorCores get
        # work); the time axis is a recurrence and must run sequentially.
        compiler_params=pltpu.CompilerParams(
            dimension_semantics=("parallel", "arbitrary")),
    )(x_pad, h0_pad, w1p, b1, w2, b2, w3p, b3p)

    return out[:T, :B, :H]


def mlp_rnn_cell(inp, hidden, kernel_params, *, scale=SCALE):
    """Single step == the PyTorch module's forward(input, hidden).

    NOTE: do not drive this in a Python/JAX loop (it re-launches the kernel and
    re-DMAs all weights every step); use mlp_rnn_cell_seq for sequences.
    """
    return mlp_rnn_cell_seq(inp[None], hidden, kernel_params, scale=scale)[0]


# ----------------------- deterministic parameter init -----------------------
def init_params(key, input_size, hidden_size, vf_hidden_size):
    """nn.Linear-style params: weight (out, in), bias (out,), float32."""
    ks = jax.random.split(key, 6)
    in1 = hidden_size + input_size

    def linear(kw, kb, fan_in, fan_out):
        bound = 1.0 / math.sqrt(fan_in)
        w = jax.random.uniform(kw, (fan_out, fan_in), jnp.float32, -bound, bound)
        b = jax.random.uniform(kb, (fan_out,), jnp.float32, -bound, bound)
        return w, b

    w1, b1 = linear(ks[0], ks[1], in1, vf_hidden_size)             # (VF, H+I)
    w2, b2 = linear(ks[2], ks[3], vf_hidden_size, vf_hidden_size)  # (VF, VF)
    w3, b3 = linear(ks[4], ks[5], vf_hidden_size, hidden_size)     # (H, VF)
    return (w1, b1, w2, b2, w3, b3)


def pack_params(torch_params, hidden_size, input_size):
    """Repack PyTorch-layout params into the kernel's resident-VMEM layout.

    W1^T is embedded in a zero-padded (128, VF) slab so that
      [h | x | 0] @ W1_packed == concat([h, x]) @ W1^T   (exact same math),
    and W3^T / b3 are zero-padded to 128 output lanes (lane-dense update/store;
    the padding MUST stay exactly zero or the packed-concat math breaks).
    Weights are bf16 (single-pass MXU); biases stay f32 (added to f32 accum).
    """
    w1, b1, w2, b2, w3, b3 = torch_params
    vf = w1.shape[0]
    hi = hidden_size + input_size
    w1p = jnp.zeros((LANE, vf), jnp.float32).at[:hi].set(w1.T)
    w3p = jnp.zeros((vf, LANE), jnp.float32).at[:, :hidden_size].set(w3.T)
    b3p = jnp.zeros((1, LANE), jnp.float32).at[0, :hidden_size].set(b3)
    return (w1p.astype(jnp.bfloat16), b1.reshape(1, -1),
            w2.T.astype(jnp.bfloat16), b2.reshape(1, -1),
            w3p.astype(jnp.bfloat16), b3p)


# ------------------------------ pure-JAX reference ---------------------------
def reference_step(x, h, torch_params, *, scale=SCALE, use_bf16=True):
    """MLPRNNCell.forward. use_bf16=True mirrors the kernel's weight precision;
    use_bf16=False is the exact f32 PyTorch semantics."""
    w1, b1, w2, b2, w3, b3 = torch_params
    wdt = jnp.bfloat16 if use_bf16 else jnp.float32

    def lin(a, w, b):
        return jnp.dot(a.astype(wdt), w.T.astype(wdt),
                       preferred_element_type=jnp.float32) + b

    xh = jnp.concatenate([h, x], axis=1)
    a1 = _gelu_exact(lin(xh, w1, b1))
    a2 = _gelu_exact(lin(a1, w2, b2))
    return h + scale * lin(a2, w3, b3)


def reference_seq(x_seq, h0, torch_params, *, scale=SCALE, use_bf16=True):
    h, hs = h0, []
    for t in range(x_seq.shape[0]):
        h = reference_step(x_seq[t], h, torch_params, scale=scale,
                           use_bf16=use_bf16)
        hs.append(h)
    return jnp.stack(hs)


if __name__ == "__main__":
    key = jax.random.PRNGKey(0)
    k_x, k_h, k_p = jax.random.split(key, 3)

    x_seq = jax.random.normal(k_x, (SEQ_LEN, BATCH, INPUT_SIZE), jnp.float32)
    h0 = jax.random.normal(k_h, (BATCH, HIDDEN_SIZE), jnp.float32)

    torch_params = init_params(k_p, INPUT_SIZE, HIDDEN_SIZE, VF_HIDDEN_SIZE)
    kparams = pack_params(torch_params, HIDDEN_SIZE, INPUT_SIZE)

    # Fused T-step recurrence in a single pallas_call (single grid step here).
    out_seq = jax.block_until_ready(mlp_rnn_cell_seq(x_seq, h0, kparams))

    # Matched-precision reference (same bf16 weights/inputs, f32 accumulation).
    ref_bf16 = reference_seq(x_seq, h0, torch_params, use_bf16=True)
    np.testing.assert_allclose(np.asarray(out_seq), np.asarray(ref_bf16),
                               rtol=2e-3, atol=2e-3)

    # Full-f32 module semantics (loose tolerance due to bf16 MXU weights).
    ref_f32 = reference_seq(x_seq, h0, torch_params, use_bf16=False)
    np.testing.assert_allclose(np.asarray(out_seq), np.asarray(ref_f32),
                               rtol=5e-2, atol=5e-2)

    # Single-step API == the module's forward(input, hidden).
    out1 = jax.block_until_ready(mlp_rnn_cell(x_seq[0], h0, kparams))
    ref1 = reference_step(x_seq[0], h0, torch_params, use_bf16=True)
    np.testing.assert_allclose(np.asarray(out1), np.asarray(ref1),
                               rtol=2e-3, atol=2e-3)

    print("KERNEL_OK")
</pallas_src>

<mosaic_0001>
module attributes {stable_mosaic.version = 11 : i64} {
  func.func @mlp_rnn_seq_kernel(%arg0: i32, %arg1: i32, %arg2: memref<8x8x128xbf16, #tpu.memory_space<vmem>>, %arg3: memref<8x128xf32, #tpu.memory_space<vmem>>, %arg4: memref<128x128xbf16, #tpu.memory_space<vmem>>, %arg5: memref<1x128xf32, #tpu.memory_space<vmem>>, %arg6: memref<128x128xbf16, #tpu.memory_space<vmem>>, %arg7: memref<1x128xf32, #tpu.memory_space<vmem>>, %arg8: memref<128x128xbf16, #tpu.memory_space<vmem>>, %arg9: memref<1x128xf32, #tpu.memory_space<vmem>>, %arg10: memref<8x8x128xf32, #tpu.memory_space<vmem>>, %arg11: memref<8x128xf32, #tpu.memory_space<vmem>>) attributes {dimension_semantics = [#tpu.dimension_semantics<parallel>, #tpu.dimension_semantics<arbitrary>], iteration_bounds = array<i64: 1, 1>, scalar_prefetch = 0 : i64, scratch_operands = 1 : i64, tpu.core_type = #tpu.core_type<tc>, window_params = [{transform_indices = @transform_0, window_bounds = array<i64: 8, 8, 128>}, {transform_indices = @transform_1, window_bounds = array<i64: 8, 128>}, {pipeline_mode = #tpu.pipeline_mode<synchronous>, transform_indices = @transform_2, window_bounds = array<i64: 128, 128>}, {pipeline_mode = #tpu.pipeline_mode<synchronous>, transform_indices = @transform_3, window_bounds = array<i64: 1, 128>}, {pipeline_mode = #tpu.pipeline_mode<synchronous>, transform_indices = @transform_4, window_bounds = array<i64: 128, 128>}, {pipeline_mode = #tpu.pipeline_mode<synchronous>, transform_indices = @transform_5, window_bounds = array<i64: 1, 128>}, {pipeline_mode = #tpu.pipeline_mode<synchronous>, transform_indices = @transform_6, window_bounds = array<i64: 128, 128>}, {pipeline_mode = #tpu.pipeline_mode<synchronous>, transform_indices = @transform_7, window_bounds = array<i64: 1, 128>}, {transform_indices = @transform_8, window_bounds = array<i64: 8, 8, 128>}]} {
    %c0_i32 = arith.constant 0 : i32
    %0 = arith.cmpi eq, %arg1, %c0_i32 : i32
    %1 = arith.extui %0 : i1 to i32
    %c0_i32_0 = arith.constant 0 : i32
    %2 = arith.cmpi ne, %1, %c0_i32_0 : i32
    scf.if %2 {
      %c0_128 = arith.constant 0 : index
      %c0_129 = arith.constant 0 : index
      %313 = vector.load %arg3[%c0_128, %c0_129] : memref<8x128xf32, #tpu.memory_space<vmem>>, vector<8x128xf32>
      %c0_130 = arith.constant 0 : index
      %c0_131 = arith.constant 0 : index
      %314 = vector.load %arg11[%c0_130, %c0_131] : memref<8x128xf32, #tpu.memory_space<vmem>>, vector<8x128xf32>
      tpu.vector_store %arg11[%c0_130, %c0_131], %313 {strides = array<i32>} : memref<8x128xf32, #tpu.memory_space<vmem>>, vector<8x128xf32>,
    } else {
    }
    %c0 = arith.constant 0 : index
    %c0_1 = arith.constant 0 : index
    %3 = vector.load %arg4[%c0, %c0_1] : memref<128x128xbf16, #tpu.memory_space<vmem>>, vector<128x128xbf16>
    %c0_2 = arith.constant 0 : index
    %c0_3 = arith.constant 0 : index
    %4 = vector.load %arg6[%c0_2, %c0_3] : memref<128x128xbf16, #tpu.memory_space<vmem>>, vector<128x128xbf16>
    %c0_4 = arith.constant 0 : index
    %c0_5 = arith.constant 0 : index
    %5 = vector.load %arg8[%c0_4, %c0_5] : memref<128x128xbf16, #tpu.memory_space<vmem>>, vector<128x128xbf16>
    %c0_6 = arith.constant 0 : index
    %c0_7 = arith.constant 0 : index
    %6 = vector.load %arg5[%c0_6, %c0_7] : memref<1x128xf32, #tpu.memory_space<vmem>>, vector<1x128xf32>
    %7 = vector.shape_cast %6 : vector<1x128xf32> to vector<1x128xf32>
    %8 = vector.broadcast %7 : vector<1x128xf32> to vector<8x128xf32>
    %c0_8 = arith.constant 0 : index
    %c0_9 = arith.constant 0 : index
    %9 = vector.load %arg7[%c0_8, %c0_9] : memref<1x128xf32, #tpu.memory_space<vmem>>, vector<1x128xf32>
    %10 = vector.shape_cast %9 : vector<1x128xf32> to vector<1x128xf32>
    %11 = vector.broadcast %10 : vector<1x128xf32> to vector<8x128xf32>
    %c0_10 = arith.constant 0 : index
    %c0_11 = arith.constant 0 : index
    %12 = vector.load %arg9[%c0_10, %c0_11] : memref<1x128xf32, #tpu.memory_space<vmem>>, vector<1x128xf32>
    %13 = vector.shape_cast %12 : vector<1x128xf32> to vector<1x128xf32>
    %14 = vector.broadcast %13 : vector<1x128xf32> to vector<8x128xf32>
    %c0_12 = arith.constant 0 : index
    %c0_13 = arith.constant 0 : index
    %15 = vector.load %arg11[%c0_12, %c0_13] : memref<8x128xf32, #tpu.memory_space<vmem>>, vector<8x128xf32>
    %c0_i32_14 = arith.constant 0 : i32
    %16 = arith.index_cast %c0_i32_14 : i32 to index
    %c0_15 = arith.constant 0 : index
    %c0_16 = arith.constant 0 : index
    %17 = vector.load %arg2[%16, %c0_15, %c0_16] : memref<8x8x128xbf16, #tpu.memory_space<vmem>>, vector<1x8x128xbf16>
    %18 = vector.shape_cast %17 : vector<1x8x128xbf16> to vector<8x128xbf16>
    %19 = arith.extf %18 : vector<8x128xbf16> to vector<8x128xf32>
    %20 = arith.addf %15, %19 : vector<8x128xf32>
    %21 = arith.truncf %20 : vector<8x128xf32> to vector<8x128xbf16>
    %cst = arith.constant dense<0.000000e+00> : vector<8x128xf32>
    %22 = tpu.matmul %21, %3, %cst {dimension_numbers = #tpu.dot_dimension_numbers<[1], [0], [0], [1], [0, 0, 1, 1], [], []>} : vector<8x128xbf16>, vector<128x128xbf16>, vector<8x128xf32> -> vector<8x128xf32>
    %23 = arith.addf %22, %8 : vector<8x128xf32>
    %cst_17 = arith.constant 5.000000e-01 : f32
    %24 = vector.broadcast %cst_17 : f32 to vector<8x128xf32>
    %25 = arith.mulf %24, %23 : vector<8x128xf32>
    %cst_18 = arith.constant 0.707106769 : f32
    %26 = vector.broadcast %cst_18 : f32 to vector<8x128xf32>
    %27 = arith.mulf %23, %26 : vector<8x128xf32>
    %28 = math.erf %27 : vector<8x128xf32>
    %cst_19 = arith.constant 1.000000e+00 : f32
    %29 = vector.broadcast %cst_19 : f32 to vector<8x128xf32>
    %30 = arith.addf %29, %28 : vector<8x128xf32>
    %31 = arith.mulf %25, %30 : vector<8x128xf32>
    %32 = arith.truncf %31 : vector<8x128xf32> to vector<8x128xbf16>
    %cst_20 = arith.constant dense<0.000000e+00> : vector<8x128xf32>
    %33 = tpu.matmul %32, %4, %cst_20 {dimension_numbers = #tpu.dot_dimension_numbers<[1], [0], [0], [1], [0, 0, 1, 1], [], []>} : vector<8x128xbf16>, vector<128x128xbf16>, vector<8x128xf32> -> vector<8x128xf32>
    %34 = arith.addf %33, %11 : vector<8x128xf32>
    %cst_21 = arith.constant 5.000000e-01 : f32
    %35 = vector.broadcast %cst_21 : f32 to vector<8x128xf32>
    %36 = arith.mulf %35, %34 : vector<8x128xf32>
    %cst_22 = arith.constant 0.707106769 : f32
    %37 = vector.broadcast %cst_22 : f32 to vector<8x128xf32>
    %38 = arith.mulf %34, %37 : vector<8x128xf32>
    %39 = math.erf %38 : vector<8x128xf32>
    %cst_23 = arith.constant 1.000000e+00 : f32
    %40 = vector.broadcast %cst_23 : f32 to vector<8x128xf32>
    %41 = arith.addf %40, %39 : vector<8x128xf32>
    %42 = arith.mulf %36, %41 : vector<8x128xf32>
    %43 = arith.truncf %42 : vector<8x128xf32> to vector<8x128xbf16>
    %cst_24 = arith.constant dense<0.000000e+00> : vector<8x128xf32>
    %44 = tpu.matmul %43, %5, %cst_24 {dimension_numbers = #tpu.dot_dimension_numbers<[1], [0], [0], [1], [0, 0, 1, 1], [], []>} : vector<8x128xbf16>, vector<128x128xbf16>, vector<8x128xf32> -> vector<8x128xf32>
    %45 = arith.addf %44, %14 : vector<8x128xf32>
    %cst_25 = arith.constant 1.000000e-01 : f32
    %46 = vector.broadcast %cst_25 : f32 to vector<8x128xf32>
    %47 = arith.mulf %46, %45 : vector<8x128xf32>
    %48 = arith.addf %15, %47 : vector<8x128xf32>
    %49 = arith.index_cast %c0_i32_14 : i32 to index
    %c0_26 = arith.constant 0 : index
    %c0_27 = arith.constant 0 : index
    %50 = vector.load %arg10[%49, %c0_26, %c0_27] : memref<8x8x128xf32, #tpu.memory_space<vmem>>, vector<1x8x128xf32>
    %51 = vector.shape_cast %50 : vector<1x8x128xf32> to vector<8x128xf32>
    %52 = vector.shape_cast %48 : vector<8x128xf32> to vector<1x8x128xf32>
    tpu.vector_store %arg10[%49, %c0_26, %c0_27], %52 {strides = array<i32>} : memref<8x8x128xf32, #tpu.memory_space<vmem>>, vector<1x8x128xf32>,
    %c1_i32 = arith.constant 1 : i32
    %53 = arith.index_cast %c1_i32 : i32 to index
    %c0_28 = arith.constant 0 : index
    %c0_29 = arith.constant 0 : index
    %54 = vector.load %arg2[%53, %c0_28, %c0_29] : memref<8x8x128xbf16, #tpu.memory_space<vmem>>, vector<1x8x128xbf16>
    %55 = vector.shape_cast %54 : vector<1x8x128xbf16> to vector<8x128xbf16>
    %56 = arith.extf %55 : vector<8x128xbf16> to vector<8x128xf32>
    %57 = arith.addf %48, %56 : vector<8x128xf32>
    %58 = arith.truncf %57 : vector<8x128xf32> to vector<8x128xbf16>
    %cst_30 = arith.constant dense<0.000000e+00> : vector<8x128xf32>
    %59 = tpu.matmul %58, %3, %cst_30 {dimension_numbers = #tpu.dot_dimension_numbers<[1], [0], [0], [1], [0, 0, 1, 1], [], []>} : vector<8x128xbf16>, vector<128x128xbf16>, vector<8x128xf32> -> vector<8x128xf32>
    %60 = arith.addf %59, %8 : vector<8x128xf32>
    %cst_31 = arith.constant 5.000000e-01 : f32
    %61 = vector.broadcast %cst_31 : f32 to vector<8x128xf32>
    %62 = arith.mulf %61, %60 : vector<8x128xf32>
    %cst_32 = arith.constant 0.707106769 : f32
    %63 = vector.broadcast %cst_32 : f32 to vector<8x128xf32>
    %64 = arith.mulf %60, %63 : vector<8x128xf32>
    %65 = math.erf %64 : vector<8x128xf32>
    %cst_33 = arith.constant 1.000000e+00 : f32
    %66 = vector.broadcast %cst_33 : f32 to vector<8x128xf32>
    %67 = arith.addf %66, %65 : vector<8x128xf32>
    %68 = arith.mulf %62, %67 : vector<8x128xf32>
    %69 = arith.truncf %68 : vector<8x128xf32> to vector<8x128xbf16>
    %cst_34 = arith.constant dense<0.000000e+00> : vector<8x128xf32>
    %70 = tpu.matmul %69, %4, %cst_34 {dimension_numbers = #tpu.dot_dimension_numbers<[1], [0], [0], [1], [0, 0, 1, 1], [], []>} : vector<8x128xbf16>, vector<128x128xbf16>, vector<8x128xf32> -> vector<8x128xf32>
    %71 = arith.addf %70, %11 : vector<8x128xf32>
    %cst_35 = arith.constant 5.000000e-01 : f32
    %72 = vector.broadcast %cst_35 : f32 to vector<8x128xf32>
    %73 = arith.mulf %72, %71 : vector<8x128xf32>
    %cst_36 = arith.constant 0.707106769 : f32
    %74 = vector.broadcast %cst_36 : f32 to vector<8x128xf32>
    %75 = arith.mulf %71, %74 : vector<8x128xf32>
    %76 = math.erf %75 : vector<8x128xf32>
    %cst_37 = arith.constant 1.000000e+00 : f32
    %77 = vector.broadcast %cst_37 : f32 to vector<8x128xf32>
    %78 = arith.addf %77, %76 : vector<8x128xf32>
    %79 = arith.mulf %73, %78 : vector<8x128xf32>
    %80 = arith.truncf %79 : vector<8x128xf32> to vector<8x128xbf16>
    %cst_38 = arith.constant dense<0.000000e+00> : vector<8x128xf32>
    %81 = tpu.matmul %80, %5, %cst_38 {dimension_numbers = #tpu.dot_dimension_numbers<[1], [0], [0], [1], [0, 0, 1, 1], [], []>} : vector<8x128xbf16>, vector<128x128xbf16>, vector<8x128xf32> -> vector<8x128xf32>
    %82 = arith.addf %81, %14 : vector<8x128xf32>
    %cst_39 = arith.constant 1.000000e-01 : f32
    %83 = vector.broadcast %cst_39 : f32 to vector<8x128xf32>
    %84 = arith.mulf %83, %82 : vector<8x128xf32>
    %85 = arith.addf %48, %84 : vector<8x128xf32>
    %86 = arith.index_cast %c1_i32 : i32 to index
    %c0_40 = arith.constant 0 : index
    %c0_41 = arith.constant 0 : index
    %87 = vector.load %arg10[%86, %c0_40, %c0_41] : memref<8x8x128xf32, #tpu.memory_space<vmem>>, vector<1x8x128xf32>
    %88 = vector.shape_cast %87 : vector<1x8x128xf32> to vector<8x128xf32>
    %89 = vector.shape_cast %85 : vector<8x128xf32> to vector<1x8x128xf32>
    tpu.vector_store %arg10[%86, %c0_40, %c0_41], %89 {strides = array<i32>} : memref<8x8x128xf32, #tpu.memory_space<vmem>>, vector<1x8x128xf32>,
    %c2_i32 = arith.constant 2 : i32
    %90 = arith.index_cast %c2_i32 : i32 to index
    %c0_42 = arith.constant 0 : index
    %c0_43 = arith.constant 0 : index
    %91 = vector.load %arg2[%90, %c0_42, %c0_43] : memref<8x8x128xbf16, #tpu.memory_space<vmem>>, vector<1x8x128xbf16>
    %92 = vector.shape_cast %91 : vector<1x8x128xbf16> to vector<8x128xbf16>
    %93 = arith.extf %92 : vector<8x128xbf16> to vector<8x128xf32>
    %94 = arith.addf %85, %93 : vector<8x128xf32>
    %95 = arith.truncf %94 : vector<8x128xf32> to vector<8x128xbf16>
    %cst_44 = arith.constant dense<0.000000e+00> : vector<8x128xf32>
    %96 = tpu.matmul %95, %3, %cst_44 {dimension_numbers = #tpu.dot_dimension_numbers<[1], [0], [0], [1], [0, 0, 1, 1], [], []>} : vector<8x128xbf16>, vector<128x128xbf16>, vector<8x128xf32> -> vector<8x128xf32>
    %97 = arith.addf %96, %8 : vector<8x128xf32>
    %cst_45 = arith.constant 5.000000e-01 : f32
    %98 = vector.broadcast %cst_45 : f32 to vector<8x128xf32>
    %99 = arith.mulf %98, %97 : vector<8x128xf32>
    %cst_46 = arith.constant 0.707106769 : f32
    %100 = vector.broadcast %cst_46 : f32 to vector<8x128xf32>
    %101 = arith.mulf %97, %100 : vector<8x128xf32>
    %102 = math.erf %101 : vector<8x128xf32>
    %cst_47 = arith.constant 1.000000e+00 : f32
    %103 = vector.broadcast %cst_47 : f32 to vector<8x128xf32>
    %104 = arith.addf %103, %102 : vector<8x128xf32>
    %105 = arith.mulf %99, %104 : vector<8x128xf32>
    %106 = arith.truncf %105 : vector<8x128xf32> to vector<8x128xbf16>
    %cst_48 = arith.constant dense<0.000000e+00> : vector<8x128xf32>
    %107 = tpu.matmul %106, %4, %cst_48 {dimension_numbers = #tpu.dot_dimension_numbers<[1], [0], [0], [1], [0, 0, 1, 1], [], []>} : vector<8x128xbf16>, vector<128x128xbf16>, vector<8x128xf32> -> vector<8x128xf32>
    %108 = arith.addf %107, %11 : vector<8x128xf32>
    %cst_49 = arith.constant 5.000000e-01 : f32
    %109 = vector.broadcast %cst_49 : f32 to vector<8x128xf32>
    %110 = arith.mulf %109, %108 : vector<8x128xf32>
    %cst_50 = arith.constant 0.707106769 : f32
    %111 = vector.broadcast %cst_50 : f32 to vector<8x128xf32>
    %112 = arith.mulf %108, %111 : vector<8x128xf32>
    %113 = math.erf %112 : vector<8x128xf32>
    %cst_51 = arith.constant 1.000000e+00 : f32
    %114 = vector.broadcast %cst_51 : f32 to vector<8x128xf32>
    %115 = arith.addf %114, %113 : vector<8x128xf32>
    %116 = arith.mulf %110, %115 : vector<8x128xf32>
    %117 = arith.truncf %116 : vector<8x128xf32> to vector<8x128xbf16>
    %cst_52 = arith.constant dense<0.000000e+00> : vector<8x128xf32>
    %118 = tpu.matmul %117, %5, %cst_52 {dimension_numbers = #tpu.dot_dimension_numbers<[1], [0], [0], [1], [0, 0, 1, 1], [], []>} : vector<8x128xbf16>, vector<128x128xbf16>, vector<8x128xf32> -> vector<8x128xf32>
    %119 = arith.addf %118, %14 : vector<8x128xf32>
    %cst_53 = arith.constant 1.000000e-01 : f32
    %120 = vector.broadcast %cst_53 : f32 to vector<8x128xf32>
    %121 = arith.mulf %120, %119 : vector<8x128xf32>
    %122 = arith.addf %85, %121 : vector<8x128xf32>
    %123 = arith.index_cast %c2_i32 : i32 to index
    %c0_54 = arith.constant 0 : index
    %c0_55 = arith.constant 0 : index
    %124 = vector.load %arg10[%123, %c0_54, %c0_55] : memref<8x8x128xf32, #tpu.memory_space<vmem>>, vector<1x8x128xf32>
    %125 = vector.shape_cast %124 : vector<1x8x128xf32> to vector<8x128xf32>
    %126 = vector.shape_cast %122 : vector<8x128xf32> to vector<1x8x128xf32>
    tpu.vector_store %arg10[%123, %c0_54, %c0_55], %126 {strides = array<i32>} : memref<8x8x128xf32, #tpu.memory_space<vmem>>, vector<1x8x128xf32>,
    %c3_i32 = arith.constant 3 : i32
    %127 = arith.index_cast %c3_i32 : i32 to index
    %c0_56 = arith.constant 0 : index
    %c0_57 = arith.constant 0 : index
    %128 = vector.load %arg2[%127, %c0_56, %c0_57] : memref<8x8x128xbf16, #tpu.memory_space<vmem>>, vector<1x8x128xbf16>
    %129 = vector.shape_cast %128 : vector<1x8x128xbf16> to vector<8x128xbf16>
    %130 = arith.extf %129 : vector<8x128xbf16> to vector<8x128xf32>
    %131 = arith.addf %122, %130 : vector<8x128xf32>
    %132 = arith.truncf %131 : vector<8x128xf32> to vector<8x128xbf16>
    %cst_58 = arith.constant dense<0.000000e+00> : vector<8x128xf32>
    %133 = tpu.matmul %132, %3, %cst_58 {dimension_numbers = #tpu.dot_dimension_numbers<[1], [0], [0], [1], [0, 0, 1, 1], [], []>} : vector<8x128xbf16>, vector<128x128xbf16>, vector<8x128xf32> -> vector<8x128xf32>
    %134 = arith.addf %133, %8 : vector<8x128xf32>
    %cst_59 = arith.constant 5.000000e-01 : f32
    %135 = vector.broadcast %cst_59 : f32 to vector<8x128xf32>
    %136 = arith.mulf %135, %134 : vector<8x128xf32>
    %cst_60 = arith.constant 0.707106769 : f32
    %137 = vector.broadcast %cst_60 : f32 to vector<8x128xf32>
    %138 = arith.mulf %134, %137 : vector<8x128xf32>
    %139 = math.erf %138 : vector<8x128xf32>
    %cst_61 = arith.constant 1.000000e+00 : f32
    %140 = vector.broadcast %cst_61 : f32 to vector<8x128xf32>
    %141 = arith.addf %140, %139 : vector<8x128xf32>
    %142 = arith.mulf %136, %141 : vector<8x128xf32>
    %143 = arith.truncf %142 : vector<8x128xf32> to vector<8x128xbf16>
    %cst_62 = arith.constant dense<0.000000e+00> : vector<8x128xf32>
    %144 = tpu.matmul %143, %4, %cst_62 {dimension_numbers = #tpu.dot_dimension_numbers<[1], [0], [0], [1], [0, 0, 1, 1], [], []>} : vector<8x128xbf16>, vector<128x128xbf16>, vector<8x128xf32> -> vector<8x128xf32>
    %145 = arith.addf %144, %11 : vector<8x128xf32>
    %cst_63 = arith.constant 5.000000e-01 : f32
    %146 = vector.broadcast %cst_63 : f32 to vector<8x128xf32>
    %147 = arith.mulf %146, %145 : vector<8x128xf32>
    %cst_64 = arith.constant 0.707106769 : f32
    %148 = vector.broadcast %cst_64 : f32 to vector<8x128xf32>
    %149 = arith.mulf %145, %148 : vector<8x128xf32>
    %150 = math.erf %149 : vector<8x128xf32>
    %cst_65 = arith.constant 1.000000e+00 : f32
    %151 = vector.broadcast %cst_65 : f32 to vector<8x128xf32>
    %152 = arith.addf %151, %150 : vector<8x128xf32>
    %153 = arith.mulf %147, %152 : vector<8x128xf32>
    %154 = arith.truncf %153 : vector<8x128xf32> to vector<8x128xbf16>
    %cst_66 = arith.constant dense<0.000000e+00> : vector<8x128xf32>
    %155 = tpu.matmul %154, %5, %cst_66 {dimension_numbers = #tpu.dot_dimension_numbers<[1], [0], [0], [1], [0, 0, 1, 1], [], []>} : vector<8x128xbf16>, vector<128x128xbf16>, vector<8x128xf32> -> vector<8x128xf32>
    %156 = arith.addf %155, %14 : vector<8x128xf32>
    %cst_67 = arith.constant 1.000000e-01 : f32
    %157 = vector.broadcast %cst_67 : f32 to vector<8x128xf32>
    %158 = arith.mulf %157, %156 : vector<8x128xf32>
    %159 = arith.addf %122, %158 : vector<8x128xf32>
    %160 = arith.index_cast %c3_i32 : i32 to index
    %c0_68 = arith.constant 0 : index
    %c0_69 = arith.constant 0 : index
    %161 = vector.load %arg10[%160, %c0_68, %c0_69] : memref<8x8x128xf32, #tpu.memory_space<vmem>>, vector<1x8x128xf32>
    %162 = vector.shape_cast %161 : vector<1x8x128xf32> to vector<8x128xf32>
    %163 = vector.shape_cast %159 : vector<8x128xf32> to vector<1x8x128xf32>
    tpu.vector_store %arg10[%160, %c0_68, %c0_69], %163 {strides = array<i32>} : memref<8x8x128xf32, #tpu.memory_space<vmem>>, vector<1x8x128xf32>,
    %c4_i32 = arith.constant 4 : i32
    %164 = arith.index_cast %c4_i32 : i32 to index
    %c0_70 = arith.constant 0 : index
    %c0_71 = arith.constant 0 : index
    %165 = vector.load %arg2[%164, %c0_70, %c0_71] : memref<8x8x128xbf16, #tpu.memory_space<vmem>>, vector<1x8x128xbf16>
    %166 = vector.shape_cast %165 : vector<1x8x128xbf16> to vector<8x128xbf16>
    %167 = arith.extf %166 : vector<8x128xbf16> to vector<8x128xf32>
    %168 = arith.addf %159, %167 : vector<8x128xf32>
    %169 = arith.truncf %168 : vector<8x128xf32> to vector<8x128xbf16>
    %cst_72 = arith.constant dense<0.000000e+00> : vector<8x128xf32>
    %170 = tpu.matmul %169, %3, %cst_72 {dimension_numbers = #tpu.dot_dimension_numbers<[1], [0], [0], [1], [0, 0, 1, 1], [], []>} : vector<8x128xbf16>, vector<128x128xbf16>, vector<8x128xf32> -> vector<8x128xf32>
    %171 = arith.addf %170, %8 : vector<8x128xf32>
    %cst_73 = arith.constant 5.000000e-01 : f32
    %172 = vector.broadcast %cst_73 : f32 to vector<8x128xf32>
    %173 = arith.mulf %172, %171 : vector<8x128xf32>
    %cst_74 = arith.constant 0.707106769 : f32
    %174 = vector.broadcast %cst_74 : f32 to vector<8x128xf32>
    %175 = arith.mulf %171, %174 : vector<8x128xf32>
    %176 = math.erf %175 : vector<8x128xf32>
    %cst_75 = arith.constant 1.000000e+00 : f32
    %177 = vector.broadcast %cst_75 : f32 to vector<8x128xf32>
    %178 = arith.addf %177, %176 : vector<8x128xf32>
    %179 = arith.mulf %173, %178 : vector<8x128xf32>
    %180 = arith.truncf %179 : vector<8x128xf32> to vector<8x128xbf16>
    %cst_76 = arith.constant dense<0.000000e+00> : vector<8x128xf32>
    %181 = tpu.matmul %180, %4, %cst_76 {dimension_numbers = #tpu.dot_dimension_numbers<[1], [0], [0], [1], [0, 0, 1, 1], [], []>} : vector<8x128xbf16>, vector<128x128xbf16>, vector<8x128xf32> -> vector<8x128xf32>
    %182 = arith.addf %181, %11 : vector<8x128xf32>
    %cst_77 = arith.constant 5.000000e-01 : f32
    %183 = vector.broadcast %cst_77 : f32 to vector<8x128xf32>
    %184 = arith.mulf %183, %182 : vector<8x128xf32>
    %cst_78 = arith.constant 0.707106769 : f32
    %185 = vector.broadcast %cst_78 : f32 to vector<8x128xf32>
    %186 = arith.mulf %182, %185 : vector<8x128xf32>
    %187 = math.erf %186 : vector<8x128xf32>
    %cst_79 = arith.constant 1.000000e+00 : f32
    %188 = vector.broadcast %cst_79 : f32 to vector<8x128xf32>
    %189 = arith.addf %188, %187 : vector<8x128xf32>
    %190 = arith.mulf %184, %189 : vector<8x128xf32>
    %191 = arith.truncf %190 : vector<8x128xf32> to vector<8x128xbf16>
    %cst_80 = arith.constant dense<0.000000e+00> : vector<8x128xf32>
    %192 = tpu.matmul %191, %5, %cst_80 {dimension_numbers = #tpu.dot_dimension_numbers<[1], [0], [0], [1], [0, 0, 1, 1], [], []>} : vector<8x128xbf16>, vector<128x128xbf16>, vector<8x128xf32> -> vector<8x128xf32>
    %193 = arith.addf %192, %14 : vector<8x128xf32>
    %cst_81 = arith.constant 1.000000e-01 : f32
    %194 = vector.broadcast %cst_81 : f32 to vector<8x128xf32>
    %195 = arith.mulf %194, %193 : vector<8x128xf32>
    %196 = arith.addf %159, %195 : vector<8x128xf32>
    %197 = arith.index_cast %c4_i32 : i32 to index
    %c0_82 = arith.constant 0 : index
    %c0_83 = arith.constant 0 : index
    %198 = vector.load %arg10[%197, %c0_82, %c0_83] : memref<8x8x128xf32, #tpu.memory_space<vmem>>, vector<1x8x128xf32>
    %199 = vector.shape_cast %198 : vector<1x8x128xf32> to vector<8x128xf32>
    %200 = vector.shape_cast %196 : vector<8x128xf32> to vector<1x8x128xf32>
    tpu.vector_store %arg10[%197, %c0_82, %c0_83], %200 {strides = array<i32>} : memref<8x8x128xf32, #tpu.memory_space<vmem>>, vector<1x8x128xf32>,
    %c5_i32 = arith.constant 5 : i32
    %201 = arith.index_cast %c5_i32 : i32 to index
    %c0_84 = arith.constant 0 : index
    %c0_85 = arith.constant 0 : index
    %202 = vector.load %arg2[%201, %c0_84, %c0_85] : memref<8x8x128xbf16, #tpu.memory_space<vmem>>, vector<1x8x128xbf16>
    %203 = vector.shape_cast %202 : vector<1x8x128xbf16> to vector<8x128xbf16>
    %204 = arith.extf %203 : vector<8x128xbf16> to vector<8x128xf32>
    %205 = arith.addf %196, %204 : vector<8x128xf32>
    %206 = arith.truncf %205 : vector<8x128xf32> to vector<8x128xbf16>
    %cst_86 = arith.constant dense<0.000000e+00> : vector<8x128xf32>
    %207 = tpu.matmul %206, %3, %cst_86 {dimension_numbers = #tpu.dot_dimension_numbers<[1], [0], [0], [1], [0, 0, 1, 1], [], []>} : vector<8x128xbf16>, vector<128x128xbf16>, vector<8x128xf32> -> vector<8x128xf32>
    %208 = arith.addf %207, %8 : vector<8x128xf32>
    %cst_87 = arith.constant 5.000000e-01 : f32
    %209 = vector.broadcast %cst_87 : f32 to vector<8x128xf32>
    %210 = arith.mulf %209, %208 : vector<8x128xf32>
    %cst_88 = arith.constant 0.707106769 : f32
    %211 = vector.broadcast %cst_88 : f32 to vector<8x128xf32>
    %212 = arith.mulf %208, %211 : vector<8x128xf32>
    %213 = math.erf %212 : vector<8x128xf32>
    %cst_89 = arith.constant 1.000000e+00 : f32
    %214 = vector.broadcast %cst_89 : f32 to vector<8x128xf32>
    %215 = arith.addf %214, %213 : vector<8x128xf32>
    %216 = arith.mulf %210, %215 : vector<8x128xf32>
    %217 = arith.truncf %216 : vector<8x128xf32> to vector<8x128xbf16>
    %cst_90 = arith.constant dense<0.000000e+00> : vector<8x128xf32>
    %218 = tpu.matmul %217, %4, %cst_90 {dimension_numbers = #tpu.dot_dimension_numbers<[1], [0], [0], [1], [0, 0, 1, 1], [], []>} : vector<8x128xbf16>, vector<128x128xbf16>, vector<8x128xf32> -> vector<8x128xf32>
    %219 = arith.addf %218, %11 : vector<8x128xf32>
    %cst_91 = arith.constant 5.000000e-01 : f32
    %220 = vector.broadcast %cst_91 : f32 to vector<8x128xf32>
    %221 = arith.mulf %220, %219 : vector<8x128xf32>
    %cst_92 = arith.constant 0.707106769 : f32
    %222 = vector.broadcast %cst_92 : f32 to vector<8x128xf32>
    %223 = arith.mulf %219, %222 : vector<8x128xf32>
    %224 = math.erf %223 : vector<8x128xf32>
    %cst_93 = arith.constant 1.000000e+00 : f32
    %225 = vector.broadcast %cst_93 : f32 to vector<8x128xf32>
    %226 = arith.addf %225, %224 : vector<8x128xf32>
    %227 = arith.mulf %221, %226 : vector<8x128xf32>
    %228 = arith.truncf %227 : vector<8x128xf32> to vector<8x128xbf16>
    %cst_94 = arith.constant dense<0.000000e+00> : vector<8x128xf32>
    %229 = tpu.matmul %228, %5, %cst_94 {dimension_numbers = #tpu.dot_dimension_numbers<[1], [0], [0], [1], [0, 0, 1, 1], [], []>} : vector<8x128xbf16>, vector<128x128xbf16>, vector<8x128xf32> -> vector<8x128xf32>
    %230 = arith.addf %229, %14 : vector<8x128xf32>
    %cst_95 = arith.constant 1.000000e-01 : f32
    %231 = vector.broadcast %cst_95 : f32 to vector<8x128xf32>
    %232 = arith.mulf %231, %230 : vector<8x128xf32>
    %233 = arith.addf %196, %232 : vector<8x128xf32>
    %234 = arith.index_cast %c5_i32 : i32 to index
    %c0_96 = arith.constant 0 : index
    %c0_97 = arith.constant 0 : index
    %235 = vector.load %arg10[%234, %c0_96, %c0_97] : memref<8x8x128xf32, #tpu.memory_space<vmem>>, vector<1x8x128xf32>
    %236 = vector.shape_cast %235 : vector<1x8x128xf32> to vector<8x128xf32>
    %237 = vector.shape_cast %233 : vector<8x128xf32> to vector<1x8x128xf32>
    tpu.vector_store %arg10[%234, %c0_96, %c0_97], %237 {strides = array<i32>} : memref<8x8x128xf32, #tpu.memory_space<vmem>>, vector<1x8x128xf32>,
    %c6_i32 = arith.constant 6 : i32
    %238 = arith.index_cast %c6_i32 : i32 to index
    %c0_98 = arith.constant 0 : index
    %c0_99 = arith.constant 0 : index
    %239 = vector.load %arg2[%238, %c0_98, %c0_99] : memref<8x8x128xbf16, #tpu.memory_space<vmem>>, vector<1x8x128xbf16>
    %240 = vector.shape_cast %239 : vector<1x8x128xbf16> to vector<8x128xbf16>
    %241 = arith.extf %240 : vector<8x128xbf16> to vector<8x128xf32>
    %242 = arith.addf %233, %241 : vector<8x128xf32>
    %243 = arith.truncf %242 : vector<8x128xf32> to vector<8x128xbf16>
    %cst_100 = arith.constant dense<0.000000e+00> : vector<8x128xf32>
    %244 = tpu.matmul %243, %3, %cst_100 {dimension_numbers = #tpu.dot_dimension_numbers<[1], [0], [0], [1], [0, 0, 1, 1], [], []>} : vector<8x128xbf16>, vector<128x128xbf16>, vector<8x128xf32> -> vector<8x128xf32>
    %245 = arith.addf %244, %8 : vector<8x128xf32>
    %cst_101 = arith.constant 5.000000e-01 : f32
    %246 = vector.broadcast %cst_101 : f32 to vector<8x128xf32>
    %247 = arith.mulf %246, %245 : vector<8x128xf32>
    %cst_102 = arith.constant 0.707106769 : f32
    %248 = vector.broadcast %cst_102 : f32 to vector<8x128xf32>
    %249 = arith.mulf %245, %248 : vector<8x128xf32>
    %250 = math.erf %249 : vector<8x128xf32>
    %cst_103 = arith.constant 1.000000e+00 : f32
    %251 = vector.broadcast %cst_103 : f32 to vector<8x128xf32>
    %252 = arith.addf %251, %250 : vector<8x128xf32>
    %253 = arith.mulf %247, %252 : vector<8x128xf32>
    %254 = arith.truncf %253 : vector<8x128xf32> to vector<8x128xbf16>
    %cst_104 = arith.constant dense<0.000000e+00> : vector<8x128xf32>
    %255 = tpu.matmul %254, %4, %cst_104 {dimension_numbers = #tpu.dot_dimension_numbers<[1], [0], [0], [1], [0, 0, 1, 1], [], []>} : vector<8x128xbf16>, vector<128x128xbf16>, vector<8x128xf32> -> vector<8x128xf32>
    %256 = arith.addf %255, %11 : vector<8x128xf32>
    %cst_105 = arith.constant 5.000000e-01 : f32
    %257 = vector.broadcast %cst_105 : f32 to vector<8x128xf32>
    %258 = arith.mulf %257, %256 : vector<8x128xf32>
    %cst_106 = arith.constant 0.707106769 : f32
    %259 = vector.broadcast %cst_106 : f32 to vector<8x128xf32>
    %260 = arith.mulf %256, %259 : vector<8x128xf32>
    %261 = math.erf %260 : vector<8x128xf32>
    %cst_107 = arith.constant 1.000000e+00 : f32
    %262 = vector.broadcast %cst_107 : f32 to vector<8x128xf32>
    %263 = arith.addf %262, %261 : vector<8x128xf32>
    %264 = arith.mulf %258, %263 : vector<8x128xf32>
    %265 = arith.truncf %264 : vector<8x128xf32> to vector<8x128xbf16>
    %cst_108 = arith.constant dense<0.000000e+00> : vector<8x128xf32>
    %266 = tpu.matmul %265, %5, %cst_108 {dimension_numbers = #tpu.dot_dimension_numbers<[1], [0], [0], [1], [0, 0, 1, 1], [], []>} : vector<8x128xbf16>, vector<128x128xbf16>, vector<8x128xf32> -> vector<8x128xf32>
    %267 = arith.addf %266, %14 : vector<8x128xf32>
    %cst_109 = arith.constant 1.000000e-01 : f32
    %268 = vector.broadcast %cst_109 : f32 to vector<8x128xf32>
    %269 = arith.mulf %268, %267 : vector<8x128xf32>
    %270 = arith.addf %233, %269 : vector<8x128xf32>
    %271 = arith.index_cast %c6_i32 : i32 to index
    %c0_110 = arith.constant 0 : index
    %c0_111 = arith.constant 0 : index
    %272 = vector.load %arg10[%271, %c0_110, %c0_111] : memref<8x8x128xf32, #tpu.memory_space<vmem>>, vector<1x8x128xf32>
    %273 = vector.shape_cast %272 : vector<1x8x128xf32> to vector<8x128xf32>
    %274 = vector.shape_cast %270 : vector<8x128xf32> to vector<1x8x128xf32>
    tpu.vector_store %arg10[%271, %c0_110, %c0_111], %274 {strides = array<i32>} : memref<8x8x128xf32, #tpu.memory_space<vmem>>, vector<1x8x128xf32>,
    %c7_i32 = arith.constant 7 : i32
    %275 = arith.index_cast %c7_i32 : i32 to index
    %c0_112 = arith.constant 0 : index
    %c0_113 = arith.constant 0 : index
    %276 = vector.load %arg2[%275, %c0_112, %c0_113] : memref<8x8x128xbf16, #tpu.memory_space<vmem>>, vector<1x8x128xbf16>
    %277 = vector.shape_cast %276 : vector<1x8x128xbf16> to vector<8x128xbf16>
    %278 = arith.extf %277 : vector<8x128xbf16> to vector<8x128xf32>
    %279 = arith.addf %270, %278 : vector<8x128xf32>
    %280 = arith.truncf %279 : vector<8x128xf32> to vector<8x128xbf16>
    %cst_114 = arith.constant dense<0.000000e+00> : vector<8x128xf32>
    %281 = tpu.matmul %280, %3, %cst_114 {dimension_numbers = #tpu.dot_dimension_numbers<[1], [0], [0], [1], [0, 0, 1, 1], [], []>} : vector<8x128xbf16>, vector<128x128xbf16>, vector<8x128xf32> -> vector<8x128xf32>
    %282 = arith.addf %281, %8 : vector<8x128xf32>
    %cst_115 = arith.constant 5.000000e-01 : f32
    %283 = vector.broadcast %cst_115 : f32 to vector<8x128xf32>
    %284 = arith.mulf %283, %282 : vector<8x128xf32>
    %cst_116 = arith.constant 0.707106769 : f32
    %285 = vector.broadcast %cst_116 : f32 to vector<8x128xf32>
    %286 = arith.mulf %282, %285 : vector<8x128xf32>
    %287 = math.erf %286 : vector<8x128xf32>
    %cst_117 = arith.constant 1.000000e+00 : f32
    %288 = vector.broadcast %cst_117 : f32 to vector<8x128xf32>
    %289 = arith.addf %288, %287 : vector<8x128xf32>
    %290 = arith.mulf %284, %289 : vector<8x128xf32>
    %291 = arith.truncf %290 : vector<8x128xf32> to vector<8x128xbf16>
    %cst_118 = arith.constant dense<0.000000e+00> : vector<8x128xf32>
    %292 = tpu.matmul %291, %4, %cst_118 {dimension_numbers = #tpu.dot_dimension_numbers<[1], [0], [0], [1], [0, 0, 1, 1], [], []>} : vector<8x128xbf16>, vector<128x128xbf16>, vector<8x128xf32> -> vector<8x128xf32>
    %293 = arith.addf %292, %11 : vector<8x128xf32>
    %cst_119 = arith.constant 5.000000e-01 : f32
    %294 = vector.broadcast %cst_119 : f32 to vector<8x128xf32>
    %295 = arith.mulf %294, %293 : vector<8x128xf32>
    %cst_120 = arith.constant 0.707106769 : f32
    %296 = vector.broadcast %cst_120 : f32 to vector<8x128xf32>
    %297 = arith.mulf %293, %296 : vector<8x128xf32>
    %298 = math.erf %297 : vector<8x128xf32>
    %cst_121 = arith.constant 1.000000e+00 : f32
    %299 = vector.broadcast %cst_121 : f32 to vector<8x128xf32>
    %300 = arith.addf %299, %298 : vector<8x128xf32>
    %301 = arith.mulf %295, %300 : vector<8x128xf32>
    %302 = arith.truncf %301 : vector<8x128xf32> to vector<8x128xbf16>
    %cst_122 = arith.constant dense<0.000000e+00> : vector<8x128xf32>
    %303 = tpu.matmul %302, %5, %cst_122 {dimension_numbers = #tpu.dot_dimension_numbers<[1], [0], [0], [1], [0, 0, 1, 1], [], []>} : vector<8x128xbf16>, vector<128x128xbf16>, vector<8x128xf32> -> vector<8x128xf32>
    %304 = arith.addf %303, %14 : vector<8x128xf32>
    %cst_123 = arith.constant 1.000000e-01 : f32
    %305 = vector.broadcast %cst_123 : f32 to vector<8x128xf32>
    %306 = arith.mulf %305, %304 : vector<8x128xf32>
    %307 = arith.addf %270, %306 : vector<8x128xf32>
    %308 = arith.index_cast %c7_i32 : i32 to index
    %c0_124 = arith.constant 0 : index
    %c0_125 = arith.constant 0 : index
    %309 = vector.load %arg10[%308, %c0_124, %c0_125] : memref<8x8x128xf32, #tpu.memory_space<vmem>>, vector<1x8x128xf32>
    %310 = vector.shape_cast %309 : vector<1x8x128xf32> to vector<8x128xf32>
    %311 = vector.shape_cast %307 : vector<8x128xf32> to vector<1x8x128xf32>
    tpu.vector_store %arg10[%308, %c0_124, %c0_125], %311 {strides = array<i32>} : memref<8x8x128xf32, #tpu.memory_space<vmem>>, vector<1x8x128xf32>,
    %c8_i32 = arith.constant 8 : i32
    %c0_126 = arith.constant 0 : index
    %c0_127 = arith.constant 0 : index
    %312 = vector.load %arg11[%c0_126, %c0_127] : memref<8x128xf32, #tpu.memory_space<vmem>>, vector<8x128xf32>
    tpu.vector_store %arg11[%c0_126, %c0_127], %307 {strides = array<i32>} : memref<8x128xf32, #tpu.memory_space<vmem>>, vector<8x128xf32>,
    return
  }
  func.func @transform_0(%arg0: i32, %arg1: i32) -> (i32, i32, i32) {
    %c0_i32 = arith.constant 0 : i32
    %c0_i32_0 = arith.constant 0 : i32
    return %arg1, %arg0, %c0_i32 : i32, i32, i32
  }
  func.func @transform_1(%arg0: i32, %arg1: i32) -> (i32, i32) {
    %c0_i32 = arith.constant 0 : i32
    %c0_i32_0 = arith.constant 0 : i32
    return %arg0, %c0_i32 : i32, i32
  }
  func.func @transform_2(%arg0: i32, %arg1: i32) -> (i32, i32) {
    %c0_i32 = arith.constant 0 : i32
    %c0_i32_0 = arith.constant 0 : i32
    %c0_i32_1 = arith.constant 0 : i32
    return %c0_i32, %c0_i32_0 : i32, i32
  }
  func.func @transform_3(%arg0: i32, %arg1: i32) -> (i32, i32) {
    %c0_i32 = arith.constant 0 : i32
    %c0_i32_0 = arith.constant 0 : i32
    %c0_i32_1 = arith.constant 0 : i32
    return %c0_i32, %c0_i32_0 : i32, i32
  }
  func.func @transform_4(%arg0: i32, %arg1: i32) -> (i32, i32) {
    %c0_i32 = arith.constant 0 : i32
    %c0_i32_0 = arith.constant 0 : i32
    %c0_i32_1 = arith.constant 0 : i32
    return %c0_i32, %c0_i32_0 : i32, i32
  }
  func.func @transform_5(%arg0: i32, %arg1: i32) -> (i32, i32) {
    %c0_i32 = arith.constant 0 : i32
    %c0_i32_0 = arith.constant 0 : i32
    %c0_i32_1 = arith.constant 0 : i32
    return %c0_i32, %c0_i32_0 : i32, i32
  }
  func.func @transform_6(%arg0: i32, %arg1: i32) -> (i32, i32) {
    %c0_i32 = arith.constant 0 : i32
    %c0_i32_0 = arith.constant 0 : i32
    %c0_i32_1 = arith.constant 0 : i32
    return %c0_i32, %c0_i32_0 : i32, i32
  }
  func.func @transform_7(%arg0: i32, %arg1: i32) -> (i32, i32) {
    %c0_i32 = arith.constant 0 : i32
    %c0_i32_0 = arith.constant 0 : i32
    %c0_i32_1 = arith.constant 0 : i32
    return %c0_i32, %c0_i32_0 : i32, i32
  }
  func.func @transform_8(%arg0: i32, %arg1: i32) -> (i32, i32, i32) {
    %c0_i32 = arith.constant 0 : i32
    %c0_i32_0 = arith.constant 0 : i32
    return %arg1, %arg0, %c0_i32 : i32, i32, i32
  }
}

</mosaic_0001>

<bundles_post_ra>
// kernel: tpu_custom_call.1
= control target key start
LH: loop header
LB: loop body
LE: loop exit
PB: predicated region body
PF: predicated region fallthrough
CT: control target
= control target key end

     0   :  { %13 = vsyncpa [#allocation4], 0  ;;  %s3118_s0 = inlined_call_operand.hbm [shape: bf16[8,8,128], index: 0, kind: input, shape index: {}]   ;;  %s3119_s1 = inlined_call_operand.hbm [shape: f32[8,128], index: 1, kind: input, shape index: {}]   ;;  %s3120_s2 = inlined_call_operand.hbm [shape: bf16[128,128], index: 2, kind: input, shape index: {}]   ;;  %s3121_s3 = inlined_call_operand.vmem [shape: f32[1,128], index: 3, kind: input, shape index: {}]   ;;  %s3122_s4 = inlined_call_operand.hbm [shape: bf16[128,128], index: 4, kind: input, shape index: {}]   ;;  %s3123_s5 = inlined_call_operand.vmem [shape: f32[1,128], index: 5, kind: input, shape index: {}]   ;;  %s3124_s6 = inlined_call_operand.hbm [shape: bf16[128,128], index: 6, kind: input, shape index: {}]   ;;  %s3125_s7 = inlined_call_operand.vmem [shape: f32[1,128], index: 7, kind: input, shape index: {}]   ;;  %s3126_s8 = inlined_call_operand.hbm [shape: f32[8,8,128], index: 8, kind: output, shape index: {}]  }
   0x1   :  { %14 = vsyncpa [#allocation7], 0 }
   0x2   :  { %15 = vsyncpa [#allocation10], 0 }
   0x3   :  { %16 = vsyncpa [#allocation5], 0  ;;  %s2409_s27 = smov [#allocation6]  }
   0x4   :  { %s35_s28 = sshll.u32 %s2409_s27, 4  ;;  %s36_s28 = int_to_ptr.vmem [resolvable:$true] %s35_s28 }
   0x5   :  { %s2289_s29 = scalar_lea.vmem %s36_s28, 128  ;;  %p2294_p1 = scmp.lt.s32.totalorder %s36_s28, %s36_s28 }
   0x6   :  { %p2290_p0 = scmp.ne.s32.totalorder %s36_s28, %s2289_s29  ;;  %p2295_p2 = scmp.lt.s32.totalorder %s2289_s29, %s2289_s29 }
   0x8   :  { %p2296_p3 = por %p2295_p2, %p2294_p1 }
   0xa   :  { %p2297_p4 = pnand %p2296_p3, %p2290_p0 }
   0xc   :  { %2300 = shalt.err (!%p2297_p4)
}
   0xd   :  { %38 = dma.hbm_to_vmem [thread:$0]  %s3119_s1, 128, %s36_s28, [#allocation7]  }
   0xe   :  { %s2410_s10 = smov [#allocation9]   ;;  %s2411_s12 = smov [#allocation3]  }
   0xf   :  { %s58_s11 = sshll.u32 %s2410_s10, 4  ;;  %s22_s13 = sshll.u32 %s2411_s12, 4  ;;  %s59_s11 = int_to_ptr.vmem [resolvable:$true] %s58_s11  ;;  %s23_s13 = int_to_ptr.vmem [resolvable:$true] %s22_s13 }
  0x10   :  { %s2309_s14 = scalar_lea.vmem %s59_s11, 1024  ;;  %p2314_p6 = scmp.lt.s32.totalorder %s59_s11, %s59_s11 }
  0x11   :  { %p2310_p5 = scmp.ne.s32.totalorder %s59_s11, %s2309_s14  ;;  %p2315_p7 = scmp.lt.s32.totalorder %s2309_s14, %s2309_s14 }
  0x13   :  { %p2316_p8 = por %p2315_p7, %p2314_p6 }
  0x15   :  { %p2317_p9 = pnand %p2316_p8, %p2310_p5 }
  0x17   :  { %2320 = shalt.err (!%p2317_p9)
}
  0x18   :  { %s2412_s15 = smov 64   ;;  %s2413_s16 = smov 4  }
  0x19   :  { %64 = dma.hbm_to_vmem [thread:$0]  %s3122_s4, 1024, %s59_s11, [#allocation10], %s2412_s15, %s2412_s15, %s2413_s16  }
  0x1a   :  { %s2329_s1 = scalar_lea.vmem %s23_s13, 512  ;;  %p2334_p11 = scmp.lt.s32.totalorder %s23_s13, %s23_s13 }
  0x1b   :  { %p2330_p10 = scmp.ne.s32.totalorder %s23_s13, %s2329_s1  ;;  %p2335_p12 = scmp.lt.s32.totalorder %s2329_s1, %s2329_s1 }
  0x1d   :  { %p2336_p13 = por %p2335_p12, %p2334_p11 }
  0x1f   :  { %p2337_p0 = pnand %p2336_p13, %p2330_p10 }
  0x21   :  { %2340 = shalt.err (!%p2337_p0)
}
  0x22   :  { %28 = dma.hbm_to_vmem [thread:$0]  %s3118_s0, 512, %s23_s13, [#allocation4], %s2412_s15, %s2412_s15, %s2413_s16  }
  0x23   :  { %s2414_s21 = smov [#allocation8]   ;;  %s2415_s23 = smov [#allocation11]  }
  0x24   :  { %s44_s22 = sshll.u32 %s2414_s21, 4  ;;  %s72_s4 = sshll.u32 %s2415_s23, 4  ;;  %s45_s22 = int_to_ptr.vmem [resolvable:$true] %s44_s22  ;;  %s73_s4 = int_to_ptr.vmem [resolvable:$true] %s72_s4 }
  0x25   :  { %s2349_s24 = scalar_lea.vmem %s45_s22, 1024  ;;  %p2354_p2 = scmp.lt.s32.totalorder %s45_s22, %s45_s22 }
  0x26   :  { %p2350_p1 = scmp.ne.s32.totalorder %s45_s22, %s2349_s24  ;;  %p2355_p3 = scmp.lt.s32.totalorder %s2349_s24, %s2349_s24 }
  0x28   :  { %p2356_p4 = por %p2355_p3, %p2354_p2 }
  0x2a   :  { %p2357_p5 = pnand %p2356_p4, %p2350_p1 }
  0x2c   :  { %2360 = shalt.err (!%p2357_p5)
}
  0x2d   :  { %50 = dma.hbm_to_vmem [thread:$0]  %s3120_s2, 1024, %s45_s22, [#allocation7], %s2412_s15, %s2412_s15, %s2413_s16  }
  0x2e   :  { %s2369_s0 = scalar_lea.vmem %s73_s4, 1024  ;;  %p2374_p7 = scmp.lt.s32.totalorder %s73_s4, %s73_s4 }
  0x2f   :  { %p2370_p6 = scmp.ne.s32.totalorder %s73_s4, %s2369_s0  ;;  %p2375_p8 = scmp.lt.s32.totalorder %s2369_s0, %s2369_s0 }
  0x31   :  { %p2376_p9 = por %p2375_p8, %p2374_p7 }
  0x33   :  { %p2377_p10 = pnand %p2376_p9, %p2370_p6 }
  0x35   :  { %2380 = shalt.err (!%p2377_p10)
}
  0x36   :  { %78 = dma.hbm_to_vmem [thread:$0]  %s3124_s6, 1024, %s73_s4, [#allocation10], %s2412_s15, %s2412_s15, %s2413_s16  }
  0x37   :  { %2401 = dma.done.wait [#allocation4], 512  }
  0x38   :  { %2402 = vsyncadd [#allocation4], 4294966784 }
  0x39   :  { %2403 = dma.done.wait [#allocation7], 1152  }
  0x3a   :  { %2404 = vsyncadd [#allocation7], 4294966144 }
  0x3b   :  { %2405 = dma.done.wait [#allocation10], 2048  }
  0x3c   :  { %2406 = vsyncadd [#allocation10], 4294965248  ;;  %v2416_v0 = vmov 0.0   ;;  %vm2417_vm0 = vmmov 0   ;;  %v2499_v1 = vld [vmem:[#allocation8 + $0x38] sm:$0xff]   ;;  %v2502_v2 = vld [vmem:[#allocation8 + $0x30] sm:$0xff]  }
  0x3d   :  { %1706 = vmatprep.subr.bf16.mxu0 %v2416_v0  ;;  %1722 = vmatprep.mubr.msk.bf16.mxu0 %vm2417_vm0, %v2416_v0  ;;  %v2506_v3 = vld [vmem:[#allocation8 + $0x28] sm:$0xff]   ;;  %v2509_v4 = vld [vmem:[#allocation9 + $0x38] sm:$0xff]   ;;  %v2512_v5 = vld [vmem:[#allocation8 + $0x20] sm:$0xff]  }
  0x3e   :  { %1726 = vmatprep.subr.bf16.mxu1 %v2416_v0  ;;  %1742 = vmatprep.mubr.msk.bf16.mxu1 %vm2417_vm0, %v2416_v0  ;;  %v2514_v6 = vld [vmem:[#allocation9 + $0x30] sm:$0xff]   ;;  %v2518_v7 = vld [vmem:[#allocation8 + $0x18] sm:$0xff]   ;;  %v2533_v11 = vld [vmem:[#allocation8 + $0x8] sm:$0xff]  }
  0x3f   :  { %1707 = vmatpush3.bf16.msra.mxu0 %v2499_v1  ;;  %1727 = vmatpush3.bf16.msra.mxu1 %v2509_v4  ;;  %v2524_v8 = vld [vmem:[#allocation8 + $0x10] sm:$0xff]   ;;  %v2526_v9 = vld [vmem:[#allocation3] sm:$0xff]   ;;  %v2540_v14 = vld [vmem:[#allocation8] sm:$0xff]  }
  0x40   :  { %1708 = vmatprep.subr.bf16.mxu0 %v2416_v0  ;;  %1728 = vmatprep.subr.bf16.mxu1 %v2416_v0  ;;  %v174_v10 = vunpack.c.l.bf16 %v2526_v9  ;;  %v2535_v12 = vld [vmem:[#allocation6] sm:$0xff]  ;;  %v2547_v16 = vld [vmem:[#allocation9 + $0x28] sm:$0xff]   ;;  %v2551_v17 = vld [vmem:[#allocation9 + $0x20] sm:$0xff]   ;;  %v458_v59 = vunpack.c.h.bf16 %v2526_v9 }
  0x41   :  { %v2554_v18 = vld [vmem:[#allocation9 + $0x18] sm:$0xff]   ;;  %v2558_v19 = vld [vmem:[#allocation9 + $0x10] sm:$0xff]   ;;  %v2562_v20 = vld [vmem:[#allocation9 + $0x8] sm:$0xff]  }
  0x42   :  { %v175_v13 = vadd.f32 %v174_v10, %v2535_v12  ;;  %v2566_v21 = vld [vmem:[#allocation9] sm:$0xff]   ;;  %v2571_v22 = vld [vmem:[#allocation11 + $0x38] sm:$0xff]   ;;  %v2574_v23 = vld [vmem:[#allocation11 + $0x30] sm:$0xff]  }
  0x43   :  { %1709 = vmatpush3.bf16.msra.mxu0 %v2502_v2  ;;  %1729 = vmatpush3.bf16.msra.mxu1 %v2514_v6  ;;  %v2582_v24 = vld [vmem:[%s3121_s3] ss:$0 sm:$0xff]  ;;  %v2603_v36 = vld [vmem:[#allocation11 + $0x28] sm:$0xff]   ;;  %v2607_v37 = vld [vmem:[#allocation11 + $0x20] sm:$0xff]  }
  0x44   :  { %1710 = vmatprep.subr.bf16.mxu0 %v2416_v0  ;;  %1730 = vmatprep.subr.bf16.mxu1 %v2416_v0  ;;  %v176_v15 = vpack.c.bf16 %v175_v13, %v175_v13  ;;  %v2611_v38 = vld [vmem:[#allocation11 + $0x18] sm:$0xff]   ;;  %v2615_v39 = vld [vmem:[#allocation11 + $0x10] sm:$0xff]   ;;  %v2619_v40 = vld [vmem:[#allocation11 + $0x8] sm:$0xff]  }
  0x45   :  { %v2623_v41 = vld [vmem:[#allocation11] sm:$0xff]   ;;  %v2630_v42 = vld [vmem:[%s3123_s5] ss:$0 sm:$0xff] }
  0x46   :  { %v2654_v54 = vld [vmem:[%s3125_s7] ss:$0 sm:$0xff] }
  0x47   :  { %1711 = vmatpush3.bf16.msra.mxu0 %v2506_v3  ;;  %1731 = vmatpush3.bf16.msra.mxu1 %v2547_v16 }
  0x48   :  { %1712 = vmatprep.subr.bf16.mxu0 %v2416_v0  ;;  %1732 = vmatprep.subr.bf16.mxu1 %v2416_v0 }
  0x4b   :  { %1713 = vmatpush3.bf16.msra.mxu0 %v2512_v5  ;;  %1733 = vmatpush3.bf16.msra.mxu1 %v2551_v17 }
  0x4c   :  { %1714 = vmatprep.subr.bf16.mxu0 %v2416_v0  ;;  %1734 = vmatprep.subr.bf16.mxu1 %v2416_v0 }
  0x4f   :  { %1715 = vmatpush3.bf16.msra.mxu0 %v2518_v7  ;;  %1735 = vmatpush3.bf16.msra.mxu1 %v2554_v18 }
  0x50   :  { %1716 = vmatprep.subr.bf16.mxu0 %v2416_v0  ;;  %1736 = vmatprep.subr.bf16.mxu1 %v2416_v0 }
  0x53   :  { %1717 = vmatpush3.bf16.msra.mxu0 %v2524_v8  ;;  %1737 = vmatpush3.bf16.msra.mxu1 %v2558_v19 }
  0x54   :  { %1718 = vmatprep.subr.bf16.mxu0 %v2416_v0  ;;  %1738 = vmatprep.subr.bf16.mxu1 %v2416_v0 }
  0x57   :  { %1719 = vmatpush3.bf16.msra.mxu0 %v2533_v11  ;;  %1739 = vmatpush3.bf16.msra.mxu1 %v2562_v20 }
  0x58   :  { %1720 = vmatprep.subr.bf16.mxu0 %v2416_v0  ;;  %1740 = vmatprep.subr.bf16.mxu1 %v2416_v0 }
  0x5b   :  { %1721 = vmatpush3.bf16.msra.mxu0 %v2540_v14  ;;  %1741 = vmatpush3.bf16.msra.mxu1 %v2566_v21 }
  0x5c   :  { %1746 = vmatprep.subr.bf16.mxu0 %v2416_v0  ;;  %1766 = vmatprep.subr.bf16.mxu1 %v2416_v0 }
  0x5e   :  { %1723 = vmatmul.mubr.bf16.vlgmr.msra.gmra.mxu0 %v176_v15 }
  0x5f   :  { %1762 = vmatprep.mubr.msk.bf16.mxu0 %vm2417_vm0, %v2416_v0  ;;  %1747 = vmatpush3.bf16.msra.mxu0 %v2571_v22 }
  0x60   :  { %1748 = vmatprep.subr.bf16.mxu0 %v2416_v0 }
  0x63   :  { %1749 = vmatpush3.bf16.msra.mxu0 %v2574_v23 }
  0x64   :  { %1750 = vmatprep.subr.bf16.mxu0 %v2416_v0 }
  0x67   :  { %1751 = vmatpush3.bf16.msra.mxu0 %v2603_v36 }
  0x68   :  { %1752 = vmatprep.subr.bf16.mxu0 %v2416_v0 }
  0x6b   :  { %1753 = vmatpush3.bf16.msra.mxu0 %v2607_v37 }
  0x6c   :  { %1754 = vmatprep.subr.bf16.mxu0 %v2416_v0 }
  0x6f   :  { %1755 = vmatpush3.bf16.msra.mxu0 %v2611_v38 }
  0x70   :  { %1756 = vmatprep.subr.bf16.mxu0 %v2416_v0 }
  0x73   :  { %1757 = vmatpush3.bf16.msra.mxu0 %v2615_v39 }
  0x74   :  { %1758 = vmatprep.subr.bf16.mxu0 %v2416_v0 }
  0x77   :  { %1759 = vmatpush3.bf16.msra.mxu0 %v2619_v40 }
  0x78   :  { %1760 = vmatprep.subr.bf16.mxu0 %v2416_v0 }
  0x7b   :  { %1761 = vmatpush3.bf16.msra.mxu0 %v2623_v41 }
  0x7c   :  { %1786 = vmatprep.subr.bf16.mxu0 %v2416_v0 }
 0x11e   :  { %v259_v25 = vpop.f32.mrf.mxu0 }
 0x11f   :  { %v260_v26 = vadd.f32 %v2582_v24, %v259_v25 }
 0x120   :  { %v1724_v27 = vpop.f32.mrf.mxu0 }
 0x121   :  { %v266_v28 = vmul.f32 0.70710677, %v260_v26  ;;  %v265_v32 = vmul.f32 0.5, %v260_v26 }
 0x122   :  { %v262_v29 = vpop.f32.mrf.mxu0 }
 0x123   :  { %2222 = verf.f32 %v266_v28 }
 0x124   :  { %v1725_v30 = vpop.f32.mrf.mxu0 }
 0x130   :  { %v2223_v31 = vpop.eup %2222 }
 0x131   :  { %v268_v33 = vadd.f32 1.0, %v2223_v31 }
 0x133   :  { %v269_v34 = vmul.f32 %v268_v33, %v265_v32 }
 0x135   :  { %v270_v35 = vpack.c.bf16 %v269_v34, %v269_v34 }
 0x137   :  { %1743 = vmatmul.mubr.bf16.vlgmr.msra.gmra.mxu1 %v270_v35 }
 0x138   :  { %1767 = vmatpush3.bf16.msra.mxu1 %v2499_v1  ;;  %1782 = vmatprep.mubr.msk.bf16.mxu1 %vm2417_vm0, %v2416_v0 }
 0x139   :  { %1768 = vmatprep.subr.bf16.mxu1 %v2416_v0 }
 0x13c   :  { %1769 = vmatpush3.bf16.msra.mxu1 %v2502_v2 }
 0x13d   :  { %1770 = vmatprep.subr.bf16.mxu1 %v2416_v0 }
 0x140   :  { %1771 = vmatpush3.bf16.msra.mxu1 %v2506_v3 }
 0x141   :  { %1772 = vmatprep.subr.bf16.mxu1 %v2416_v0 }
 0x144   :  { %1773 = vmatpush3.bf16.msra.mxu1 %v2512_v5 }
 0x145   :  { %1774 = vmatprep.subr.bf16.mxu1 %v2416_v0 }
 0x148   :  { %1775 = vmatpush3.bf16.msra.mxu1 %v2518_v7 }
 0x149   :  { %1776 = vmatprep.subr.bf16.mxu1 %v2416_v0 }
 0x14c   :  { %1777 = vmatpush3.bf16.msra.mxu1 %v2524_v8 }
 0x14d   :  { %1778 = vmatprep.subr.bf16.mxu1 %v2416_v0 }
 0x150   :  { %1779 = vmatpush3.bf16.msra.mxu1 %v2533_v11 }
 0x151   :  { %1780 = vmatprep.subr.bf16.mxu1 %v2416_v0 }
 0x154   :  { %1781 = vmatpush3.bf16.msra.mxu1 %v2540_v14 }
 0x155   :  { %1806 = vmatprep.subr.bf16.mxu1 %v2416_v0 }
 0x1f7   :  { %v353_v43 = vpop.f32.mrf.mxu1 }
 0x1f8   :  { %v354_v44 = vadd.f32 %v2630_v42, %v353_v43 }
 0x1f9   :  { %v1744_v45 = vpop.f32.mrf.mxu1 }
 0x1fa   :  { %v360_v46 = vmul.f32 0.70710677, %v354_v44  ;;  %v359_v50 = vmul.f32 0.5, %v354_v44 }
 0x1fb   :  { %v356_v47 = vpop.f32.mrf.mxu1 }
 0x1fc   :  { %2224 = verf.f32 %v360_v46 }
 0x1fd   :  { %v1745_v48 = vpop.f32.mrf.mxu1 }
 0x209   :  { %v2225_v49 = vpop.eup %2224 }
 0x20a   :  { %v362_v51 = vadd.f32 1.0, %v2225_v49 }
 0x20c   :  { %v363_v52 = vmul.f32 %v362_v51, %v359_v50  ;;  %v2719_v51 = vld [vmem:[#allocation3 + $0x8] sm:$0xff]  }
 0x20e   :  { %v364_v53 = vpack.c.bf16 %v363_v52, %v363_v52 }
 0x210   :  { %1763 = vmatmul.mubr.bf16.vlgmr.msra.gmra.mxu0 %v364_v53 }
 0x211   :  { %1787 = vmatpush3.bf16.msra.mxu0 %v2509_v4  ;;  %1802 = vmatprep.mubr.msk.bf16.mxu0 %vm2417_vm0, %v2416_v0 }
 0x212   :  { %1788 = vmatprep.subr.bf16.mxu0 %v2416_v0 }
 0x215   :  { %1789 = vmatpush3.bf16.msra.mxu0 %v2514_v6 }
 0x216   :  { %1790 = vmatprep.subr.bf16.mxu0 %v2416_v0 }
 0x219   :  { %1791 = vmatpush3.bf16.msra.mxu0 %v2547_v16 }
 0x21a   :  { %1792 = vmatprep.subr.bf16.mxu0 %v2416_v0 }
 0x21d   :  { %1793 = vmatpush3.bf16.msra.mxu0 %v2551_v17 }
 0x21e   :  { %1794 = vmatprep.subr.bf16.mxu0 %v2416_v0 }
 0x221   :  { %1795 = vmatpush3.bf16.msra.mxu0 %v2554_v18 }
 0x222   :  { %1796 = vmatprep.subr.bf16.mxu0 %v2416_v0 }
 0x225   :  { %1797 = vmatpush3.bf16.msra.mxu0 %v2558_v19 }
 0x226   :  { %1798 = vmatprep.subr.bf16.mxu0 %v2416_v0 }
 0x229   :  { %1799 = vmatpush3.bf16.msra.mxu0 %v2562_v20 }
 0x22a   :  { %1800 = vmatprep.subr.bf16.mxu0 %v2416_v0 }
 0x22d   :  { %1801 = vmatpush3.bf16.msra.mxu0 %v2566_v21 }
 0x22e   :  { %1826 = vmatprep.subr.bf16.mxu0 %v2416_v0 }
 0x2d0   :  { %v447_v55 = vpop.f32.mrf.mxu0 }
 0x2d1   :  { %v448_v56 = vadd.f32 %v2654_v54, %v447_v55 }
 0x2d2   :  { %v1764_v57 = vpop.f32.mrf.mxu0 }
 0x2d3   :  { %v453_v58 = vmul.f32 0.1, %v448_v56  ;;  %v599_v56 = vunpack.c.l.bf16 %v2719_v51 }
 0x2d4   :  { %v450_v60 = vpop.f32.mrf.mxu0 }
 0x2d5   :  { %v2659_v61 = vadd.f32 %v453_v58, %v2535_v12 }
 0x2d6   :  { %v1765_v62 = vpop.f32.mrf.mxu0 }
 0x2d7   :  { %455 = vst [vmem:[#allocation12] sm:$0xff] %v2659_v61  ;;  %v459_v63 = vadd.f32 %v458_v59, %v2659_v61 }
 0x2d9   :  { %v460_v10 = vpack.c.bf16 %v459_v63, %v459_v63 }
 0x2db   :  { %1783 = vmatmul.mubr.bf16.vlgmr.msra.gmra.mxu1 %v460_v10 }
 0x2dc   :  { %1807 = vmatpush3.bf16.msra.mxu1 %v2571_v22  ;;  %1822 = vmatprep.mubr.msk.bf16.mxu1 %vm2417_vm0, %v2416_v0 }
 0x2dd   :  { %1808 = vmatprep.subr.bf16.mxu1 %v2416_v0 }
 0x2e0   :  { %1809 = vmatpush3.bf16.msra.mxu1 %v2574_v23 }
 0x2e1   :  { %1810 = vmatprep.subr.bf16.mxu1 %v2416_v0 }
 0x2e4   :  { %1811 = vmatpush3.bf16.msra.mxu1 %v2603_v36 }
 0x2e5   :  { %1812 = vmatprep.subr.bf16.mxu1 %v2416_v0 }
 0x2e8   :  { %1813 = vmatpush3.bf16.msra.mxu1 %v2607_v37 }
 0x2e9   :  { %1814 = vmatprep.subr.bf16.mxu1 %v2416_v0 }
 0x2ec   :  { %1815 = vmatpush3.bf16.msra.mxu1 %v2611_v38 }
 0x2ed   :  { %1816 = vmatprep.subr.bf16.mxu1 %v2416_v0 }
 0x2f0   :  { %1817 = vmatpush3.bf16.msra.mxu1 %v2615_v39 }
 0x2f1   :  { %1818 = vmatprep.subr.bf16.mxu1 %v2416_v0 }
 0x2f4   :  { %1819 = vmatpush3.bf16.msra.mxu1 %v2619_v40 }
 0x2f5   :  { %1820 = vmatprep.subr.bf16.mxu1 %v2416_v0 }
 0x2f8   :  { %1821 = vmatpush3.bf16.msra.mxu1 %v2623_v41 }
 0x2f9   :  { %1846 = vmatprep.subr.bf16.mxu1 %v2416_v0 }
 0x39b   :  { %v495_v9 = vpop.f32.mrf.mxu1 }
 0x39c   :  { %v496_v12 = vadd.f32 %v2582_v24, %v495_v9 }
 0x39d   :  { %v1784_v13 = vpop.f32.mrf.mxu1 }
 0x39e   :  { %v502_v15 = vmul.f32 0.70710677, %v496_v12  ;;  %v501_v28 = vmul.f32 0.5, %v496_v12 }
 0x39f   :  { %v498_v25 = vpop.f32.mrf.mxu1 }
 0x3a0   :  { %2226 = verf.f32 %v502_v15 }
 0x3a1   :  { %v1785_v26 = vpop.f32.mrf.mxu1 }
 0x3ad   :  { %v2227_v27 = vpop.eup %2226 }
 0x3ae   :  { %v504_v29 = vadd.f32 1.0, %v2227_v27 }
 0x3b0   :  { %v505_v30 = vmul.f32 %v504_v29, %v501_v28 }
 0x3b2   :  { %v506_v31 = vpack.c.bf16 %v505_v30, %v505_v30 }
 0x3b4   :  { %1803 = vmatmul.mubr.bf16.vlgmr.msra.gmra.mxu0 %v506_v31 }
 0x3b5   :  { %1827 = vmatpush3.bf16.msra.mxu0 %v2499_v1  ;;  %1842 = vmatprep.mubr.msk.bf16.mxu0 %vm2417_vm0, %v2416_v0 }
 0x3b6   :  { %1828 = vmatprep.subr.bf16.mxu0 %v2416_v0 }
 0x3b9   :  { %1829 = vmatpush3.bf16.msra.mxu0 %v2502_v2 }
 0x3ba   :  { %1830 = vmatprep.subr.bf16.mxu0 %v2416_v0 }
 0x3bd   :  { %1831 = vmatpush3.bf16.msra.mxu0 %v2506_v3 }
 0x3be   :  { %1832 = vmatprep.subr.bf16.mxu0 %v2416_v0 }
 0x3c1   :  { %1833 = vmatpush3.bf16.msra.mxu0 %v2512_v5 }
 0x3c2   :  { %1834 = vmatprep.subr.bf16.mxu0 %v2416_v0 }
 0x3c5   :  { %1835 = vmatpush3.bf16.msra.mxu0 %v2518_v7 }
 0x3c6   :  { %1836 = vmatprep.subr.bf16.mxu0 %v2416_v0 }
 0x3c9   :  { %1837 = vmatpush3.bf16.msra.mxu0 %v2524_v8 }
 0x3ca   :  { %1838 = vmatprep.subr.bf16.mxu0 %v2416_v0 }
 0x3cd   :  { %1839 = vmatpush3.bf16.msra.mxu0 %v2533_v11 }
 0x3ce   :  { %1840 = vmatprep.subr.bf16.mxu0 %v2416_v0 }
 0x3d1   :  { %1841 = vmatpush3.bf16.msra.mxu0 %v2540_v14 }
 0x3d2   :  { %1866 = vmatprep.subr.bf16.mxu0 %v2416_v0 }
 0x474   :  { %v541_v32 = vpop.f32.mrf.mxu0 }
 0x475   :  { %v542_v33 = vadd.f32 %v2630_v42, %v541_v32 }
 0x476   :  { %v1804_v34 = vpop.f32.mrf.mxu0 }
 0x477   :  { %v548_v35 = vmul.f32 0.70710677, %v542_v33  ;;  %v547_v46 = vmul.f32 0.5, %v542_v33 }
 0x478   :  { %v544_v43 = vpop.f32.mrf.mxu0 }
 0x479   :  { %2228 = verf.f32 %v548_v35 }
 0x47a   :  { %v1805_v44 = vpop.f32.mrf.mxu0 }
 0x486   :  { %v2229_v45 = vpop.eup %2228 }
 0x487   :  { %v550_v47 = vadd.f32 1.0, %v2229_v45 }
 0x489   :  { %v551_v48 = vmul.f32 %v550_v47, %v547_v46 }
 0x48b   :  { %v552_v49 = vpack.c.bf16 %v551_v48, %v551_v48 }
 0x48d   :  { %1823 = vmatmul.mubr.bf16.vlgmr.msra.gmra.mxu1 %v552_v49 }
 0x48e   :  { %1847 = vmatpush3.bf16.msra.mxu1 %v2509_v4  ;;  %1862 = vmatprep.mubr.msk.bf16.mxu1 %vm2417_vm0, %v2416_v0 }
 0x48f   :  { %1848 = vmatprep.subr.bf16.mxu1 %v2416_v0 }
 0x492   :  { %1849 = vmatpush3.bf16.msra.mxu1 %v2514_v6 }
 0x493   :  { %1850 = vmatprep.subr.bf16.mxu1 %v2416_v0 }
 0x496   :  { %1851 = vmatpush3.bf16.msra.mxu1 %v2547_v16 }
 0x497   :  { %1852 = vmatprep.subr.bf16.mxu1 %v2416_v0 }
 0x49a   :  { %1853 = vmatpush3.bf16.msra.mxu1 %v2551_v17 }
 0x49b   :  { %1854 = vmatprep.subr.bf16.mxu1 %v2416_v0 }
 0x49e   :  { %1855 = vmatpush3.bf16.msra.mxu1 %v2554_v18 }
 0x49f   :  { %1856 = vmatprep.subr.bf16.mxu1 %v2416_v0 }
 0x4a2   :  { %1857 = vmatpush3.bf16.msra.mxu1 %v2558_v19 }
 0x4a3   :  { %1858 = vmatprep.subr.bf16.mxu1 %v2416_v0 }
 0x4a6   :  { %1859 = vmatpush3.bf16.msra.mxu1 %v2562_v20 }
 0x4a7   :  { %1860 = vmatprep.subr.bf16.mxu1 %v2416_v0 }
 0x4aa   :  { %1861 = vmatpush3.bf16.msra.mxu1 %v2566_v21 }
 0x4ab   :  { %1886 = vmatprep.subr.bf16.mxu1 %v2416_v0 }
 0x54d   :  { %v587_v50 = vpop.f32.mrf.mxu1 }
 0x54e   :  { %v588_v52 = vadd.f32 %v2654_v54, %v587_v50 }
 0x54f   :  { %v1824_v53 = vpop.f32.mrf.mxu1 }
 0x550   :  { %v593_v55 = vmul.f32 0.1, %v588_v52  ;;  %v740_v52 = vunpack.c.h.bf16 %v2719_v51 }
 0x551   :  { %v590_v57 = vpop.f32.mrf.mxu1 }
 0x552   :  { %v2724_v58 = vadd.f32 %v593_v55, %v2659_v61 }
 0x553   :  { %v1825_v59 = vpop.f32.mrf.mxu1 }
 0x554   :  { %596 = vst [vmem:[#allocation12 + $0x8] sm:$0xff] %v2724_v58  ;;  %v600_v60 = vadd.f32 %v599_v56, %v2724_v58 }
 0x556   :  { %v601_v62 = vpack.c.bf16 %v600_v60, %v600_v60 }
 0x558   :  { %1843 = vmatmul.mubr.bf16.vlgmr.msra.gmra.mxu0 %v601_v62 }
 0x559   :  { %1867 = vmatpush3.bf16.msra.mxu0 %v2571_v22  ;;  %1882 = vmatprep.mubr.msk.bf16.mxu0 %vm2417_vm0, %v2416_v0 }
 0x55a   :  { %1868 = vmatprep.subr.bf16.mxu0 %v2416_v0 }
 0x55d   :  { %1869 = vmatpush3.bf16.msra.mxu0 %v2574_v23 }
 0x55e   :  { %1870 = vmatprep.subr.bf16.mxu0 %v2416_v0 }
 0x561   :  { %1871 = vmatpush3.bf16.msra.mxu0 %v2603_v36 }
 0x562   :  { %1872 = vmatprep.subr.bf16.mxu0 %v2416_v0 }
 0x565   :  { %1873 = vmatpush3.bf16.msra.mxu0 %v2607_v37 }
 0x566   :  { %1874 = vmatprep.subr.bf16.mxu0 %v2416_v0 }
 0x569   :  { %1875 = vmatpush3.bf16.msra.mxu0 %v2611_v38 }
 0x56a   :  { %1876 = vmatprep.subr.bf16.mxu0 %v2416_v0 }
 0x56d   :  { %1877 = vmatpush3.bf16.msra.mxu0 %v2615_v39 }
 0x56e   :  { %1878 = vmatprep.subr.bf16.mxu0 %v2416_v0 }
 0x571   :  { %1879 = vmatpush3.bf16.msra.mxu0 %v2619_v40 }
 0x572   :  { %1880 = vmatprep.subr.bf16.mxu0 %v2416_v0 }
 0x575   :  { %1881 = vmatpush3.bf16.msra.mxu0 %v2623_v41 }
 0x576   :  { %1906 = vmatprep.subr.bf16.mxu0 %v2416_v0 }
 0x618   :  { %v636_v61 = vpop.f32.mrf.mxu0 }
 0x619   :  { %v637_v63 = vadd.f32 %v2582_v24, %v636_v61 }
 0x61a   :  { %v1844_v10 = vpop.f32.mrf.mxu0 }
 0x61b   :  { %v643_v9 = vmul.f32 0.70710677, %v637_v63  ;;  %v642_v25 = vmul.f32 0.5, %v637_v63 }
 0x61c   :  { %v639_v12 = vpop.f32.mrf.mxu0 }
 0x61d   :  { %2230 = verf.f32 %v643_v9 }
 0x61e   :  { %v1845_v13 = vpop.f32.mrf.mxu0 }
 0x62a   :  { %v2231_v15 = vpop.eup %2230 }
 0x62b   :  { %v645_v26 = vadd.f32 1.0, %v2231_v15 }
 0x62d   :  { %v646_v27 = vmul.f32 %v645_v26, %v642_v25 }
 0x62f   :  { %v647_v28 = vpack.c.bf16 %v646_v27, %v646_v27 }
 0x631   :  { %1863 = vmatmul.mubr.bf16.vlgmr.msra.gmra.mxu1 %v647_v28 }
 0x632   :  { %1887 = vmatpush3.bf16.msra.mxu1 %v2499_v1  ;;  %1902 = vmatprep.mubr.msk.bf16.mxu1 %vm2417_vm0, %v2416_v0 }
 0x633   :  { %1888 = vmatprep.subr.bf16.mxu1 %v2416_v0 }
 0x636   :  { %1889 = vmatpush3.bf16.msra.mxu1 %v2502_v2 }
 0x637   :  { %1890 = vmatprep.subr.bf16.mxu1 %v2416_v0 }
 0x63a   :  { %1891 = vmatpush3.bf16.msra.mxu1 %v2506_v3 }
 0x63b   :  { %1892 = vmatprep.subr.bf16.mxu1 %v2416_v0 }
 0x63e   :  { %1893 = vmatpush3.bf16.msra.mxu1 %v2512_v5 }
 0x63f   :  { %1894 = vmatprep.subr.bf16.mxu1 %v2416_v0 }
 0x642   :  { %1895 = vmatpush3.bf16.msra.mxu1 %v2518_v7 }
 0x643   :  { %1896 = vmatprep.subr.bf16.mxu1 %v2416_v0 }
 0x646   :  { %1897 = vmatpush3.bf16.msra.mxu1 %v2524_v8 }
 0x647   :  { %1898 = vmatprep.subr.bf16.mxu1 %v2416_v0 }
 0x64a   :  { %1899 = vmatpush3.bf16.msra.mxu1 %v2533_v11 }
 0x64b   :  { %1900 = vmatprep.subr.bf16.mxu1 %v2416_v0 }
 0x64e   :  { %1901 = vmatpush3.bf16.msra.mxu1 %v2540_v14 }
 0x64f   :  { %1926 = vmatprep.subr.bf16.mxu1 %v2416_v0 }
 0x6f1   :  { %v682_v29 = vpop.f32.mrf.mxu1 }
 0x6f2   :  { %v683_v30 = vadd.f32 %v2630_v42, %v682_v29 }
 0x6f3   :  { %v1864_v31 = vpop.f32.mrf.mxu1 }
 0x6f4   :  { %v689_v32 = vmul.f32 0.70710677, %v683_v30  ;;  %v688_v43 = vmul.f32 0.5, %v683_v30 }
 0x6f5   :  { %v685_v33 = vpop.f32.mrf.mxu1 }
 0x6f6   :  { %2232 = verf.f32 %v689_v32 }
 0x6f7   :  { %v1865_v34 = vpop.f32.mrf.mxu1 }
 0x703   :  { %v2233_v35 = vpop.eup %2232 }
 0x704   :  { %v691_v44 = vadd.f32 1.0, %v2233_v35 }
 0x706   :  { %v692_v45 = vmul.f32 %v691_v44, %v688_v43  ;;  %v2847_v44 = vld [vmem:[#allocation3 + $0x10] sm:$0xff]  }
 0x708   :  { %v693_v46 = vpack.c.bf16 %v692_v45, %v692_v45 }
 0x70a   :  { %1883 = vmatmul.mubr.bf16.vlgmr.msra.gmra.mxu0 %v693_v46 }
 0x70b   :  { %1907 = vmatpush3.bf16.msra.mxu0 %v2509_v4  ;;  %1922 = vmatprep.mubr.msk.bf16.mxu0 %vm2417_vm0, %v2416_v0 }
 0x70c   :  { %1908 = vmatprep.subr.bf16.mxu0 %v2416_v0 }
 0x70f   :  { %1909 = vmatpush3.bf16.msra.mxu0 %v2514_v6 }
 0x710   :  { %1910 = vmatprep.subr.bf16.mxu0 %v2416_v0 }
 0x713   :  { %1911 = vmatpush3.bf16.msra.mxu0 %v2547_v16 }
 0x714   :  { %1912 = vmatprep.subr.bf16.mxu0 %v2416_v0 }
 0x717   :  { %1913 = vmatpush3.bf16.msra.mxu0 %v2551_v17 }
 0x718   :  { %1914 = vmatprep.subr.bf16.mxu0 %v2416_v0 }
 0x71b   :  { %1915 = vmatpush3.bf16.msra.mxu0 %v2554_v18 }
 0x71c   :  { %1916 = vmatprep.subr.bf16.mxu0 %v2416_v0 }
 0x71f   :  { %1917 = vmatpush3.bf16.msra.mxu0 %v2558_v19 }
 0x720   :  { %1918 = vmatprep.subr.bf16.mxu0 %v2416_v0 }
 0x723   :  { %1919 = vmatpush3.bf16.msra.mxu0 %v2562_v20 }
 0x724   :  { %1920 = vmatprep.subr.bf16.mxu0 %v2416_v0 }
 0x727   :  { %1921 = vmatpush3.bf16.msra.mxu0 %v2566_v21 }
 0x728   :  { %1946 = vmatprep.subr.bf16.mxu0 %v2416_v0 }
 0x7ca   :  { %v728_v47 = vpop.f32.mrf.mxu0 }
 0x7cb   :  { %v729_v48 = vadd.f32 %v2654_v54, %v728_v47 }
 0x7cc   :  { %v1884_v49 = vpop.f32.mrf.mxu0 }
 0x7cd   :  { %v734_v50 = vmul.f32 0.1, %v729_v48  ;;  %v881_v48 = vunpack.c.l.bf16 %v2847_v44 }
 0x7ce   :  { %v731_v53 = vpop.f32.mrf.mxu0 }
 0x7cf   :  { %v2787_v55 = vadd.f32 %v734_v50, %v2724_v58 }
 0x7d0   :  { %v1885_v56 = vpop.f32.mrf.mxu0 }
 0x7d1   :  { %737 = vst [vmem:[#allocation12 + $0x10] sm:$0xff] %v2787_v55  ;;  %v741_v57 = vadd.f32 %v740_v52, %v2787_v55 }
 0x7d3   :  { %v742_v59 = vpack.c.bf16 %v741_v57, %v741_v57 }
 0x7d5   :  { %1903 = vmatmul.mubr.bf16.vlgmr.msra.gmra.mxu1 %v742_v59 }
 0x7d6   :  { %1927 = vmatpush3.bf16.msra.mxu1 %v2571_v22  ;;  %1942 = vmatprep.mubr.msk.bf16.mxu1 %vm2417_vm0, %v2416_v0 }
 0x7d7   :  { %1928 = vmatprep.subr.bf16.mxu1 %v2416_v0 }
 0x7da   :  { %1929 = vmatpush3.bf16.msra.mxu1 %v2574_v23 }
 0x7db   :  { %1930 = vmatprep.subr.bf16.mxu1 %v2416_v0 }
 0x7de   :  { %1931 = vmatpush3.bf16.msra.mxu1 %v2603_v36 }
 0x7df   :  { %1932 = vmatprep.subr.bf16.mxu1 %v2416_v0 }
 0x7e2   :  { %1933 = vmatpush3.bf16.msra.mxu1 %v2607_v37 }
 0x7e3   :  { %1934 = vmatprep.subr.bf16.mxu1 %v2416_v0 }
 0x7e6   :  { %1935 = vmatpush3.bf16.msra.mxu1 %v2611_v38 }
 0x7e7   :  { %1936 = vmatprep.subr.bf16.mxu1 %v2416_v0 }
 0x7ea   :  { %1937 = vmatpush3.bf16.msra.mxu1 %v2615_v39 }
 0x7eb   :  { %1938 = vmatprep.subr.bf16.mxu1 %v2416_v0 }
 0x7ee   :  { %1939 = vmatpush3.bf16.msra.mxu1 %v2619_v40 }
 0x7ef   :  { %1940 = vmatprep.subr.bf16.mxu1 %v2416_v0 }
 0x7f2   :  { %1941 = vmatpush3.bf16.msra.mxu1 %v2623_v41 }
 0x7f3   :  { %1966 = vmatprep.subr.bf16.mxu1 %v2416_v0 }
 0x895   :  { %v777_v51 = vpop.f32.mrf.mxu1 }
 0x896   :  { %v778_v58 = vadd.f32 %v2582_v24, %v777_v51 }
 0x897   :  { %v1904_v60 = vpop.f32.mrf.mxu1 }
 0x898   :  { %v784_v62 = vmul.f32 0.70710677, %v778_v58  ;;  %v783_v9 = vmul.f32 0.5, %v778_v58 }
 0x899   :  { %v780_v61 = vpop.f32.mrf.mxu1 }
 0x89a   :  { %2234 = verf.f32 %v784_v62 }
 0x89b   :  { %v1905_v63 = vpop.f32.mrf.mxu1 }
 0x8a7   :  { %v2235_v10 = vpop.eup %2234 }
 0x8a8   :  { %v786_v12 = vadd.f32 1.0, %v2235_v10 }
 0x8aa   :  { %v787_v13 = vmul.f32 %v786_v12, %v783_v9 }
 0x8ac   :  { %v788_v15 = vpack.c.bf16 %v787_v13, %v787_v13 }
 0x8ae   :  { %1923 = vmatmul.mubr.bf16.vlgmr.msra.gmra.mxu0 %v788_v15 }
 0x8af   :  { %1947 = vmatpush3.bf16.msra.mxu0 %v2499_v1  ;;  %1962 = vmatprep.mubr.msk.bf16.mxu0 %vm2417_vm0, %v2416_v0 }
 0x8b0   :  { %1948 = vmatprep.subr.bf16.mxu0 %v2416_v0 }
 0x8b3   :  { %1949 = vmatpush3.bf16.msra.mxu0 %v2502_v2 }
 0x8b4   :  { %1950 = vmatprep.subr.bf16.mxu0 %v2416_v0 }
 0x8b7   :  { %1951 = vmatpush3.bf16.msra.mxu0 %v2506_v3 }
 0x8b8   :  { %1952 = vmatprep.subr.bf16.mxu0 %v2416_v0 }
 0x8bb   :  { %1953 = vmatpush3.bf16.msra.mxu0 %v2512_v5 }
 0x8bc   :  { %1954 = vmatprep.subr.bf16.mxu0 %v2416_v0 }
 0x8bf   :  { %1955 = vmatpush3.bf16.msra.mxu0 %v2518_v7 }
 0x8c0   :  { %1956 = vmatprep.subr.bf16.mxu0 %v2416_v0 }
 0x8c3   :  { %1957 = vmatpush3.bf16.msra.mxu0 %v2524_v8 }
 0x8c4   :  { %1958 = vmatprep.subr.bf16.mxu0 %v2416_v0 }
 0x8c7   :  { %1959 = vmatpush3.bf16.msra.mxu0 %v2533_v11 }
 0x8c8   :  { %1960 = vmatprep.subr.bf16.mxu0 %v2416_v0 }
 0x8cb   :  { %1961 = vmatpush3.bf16.msra.mxu0 %v2540_v14 }
 0x8cc   :  { %1986 = vmatprep.subr.bf16.mxu0 %v2416_v0 }
 0x96e   :  { %v823_v25 = vpop.f32.mrf.mxu0 }
 0x96f   :  { %v824_v26 = vadd.f32 %v2630_v42, %v823_v25 }
 0x970   :  { %v1924_v27 = vpop.f32.mrf.mxu0 }
 0x971   :  { %v830_v28 = vmul.f32 0.70710677, %v824_v26  ;;  %v829_v32 = vmul.f32 0.5, %v824_v26 }
 0x972   :  { %v826_v29 = vpop.f32.mrf.mxu0 }
 0x973   :  { %2236 = verf.f32 %v830_v28 }
 0x974   :  { %v1925_v30 = vpop.f32.mrf.mxu0 }
 0x980   :  { %v2237_v31 = vpop.eup %2236 }
 0x981   :  { %v832_v33 = vadd.f32 1.0, %v2237_v31 }
 0x983   :  { %v833_v34 = vmul.f32 %v832_v33, %v829_v32  ;;  %v2938_v32 = vld [vmem:[#allocation8 + $0x38] sm:$0xff]   ;;  %v2948_v33 = vld [vmem:[#allocation8 + $0x28] sm:$0xff]  }
 0x985   :  { %v834_v35 = vpack.c.bf16 %v833_v34, %v833_v34  ;;  %v2952_v34 = vld [vmem:[#allocation8 + $0x20] sm:$0xff]  }
 0x987   :  { %1943 = vmatmul.mubr.bf16.vlgmr.msra.gmra.mxu1 %v834_v35  ;;  %v2956_v35 = vld [vmem:[#allocation8 + $0x18] sm:$0xff]  }
 0x988   :  { %1967 = vmatpush3.bf16.msra.mxu1 %v2509_v4  ;;  %1982 = vmatprep.mubr.msk.bf16.mxu1 %vm2417_vm0, %v2416_v0 }
 0x989   :  { %1968 = vmatprep.subr.bf16.mxu1 %v2416_v0 }
 0x98c   :  { %1969 = vmatpush3.bf16.msra.mxu1 %v2514_v6 }
 0x98d   :  { %1970 = vmatprep.subr.bf16.mxu1 %v2416_v0 }
 0x990   :  { %1971 = vmatpush3.bf16.msra.mxu1 %v2547_v16 }
 0x991   :  { %1972 = vmatprep.subr.bf16.mxu1 %v2416_v0 }
 0x994   :  { %1973 = vmatpush3.bf16.msra.mxu1 %v2551_v17 }
 0x995   :  { %1974 = vmatprep.subr.bf16.mxu1 %v2416_v0 }
 0x998   :  { %1975 = vmatpush3.bf16.msra.mxu1 %v2554_v18 }
 0x999   :  { %1976 = vmatprep.subr.bf16.mxu1 %v2416_v0 }
 0x99c   :  { %1977 = vmatpush3.bf16.msra.mxu1 %v2558_v19 }
 0x99d   :  { %1978 = vmatprep.subr.bf16.mxu1 %v2416_v0 }
 0x9a0   :  { %1979 = vmatpush3.bf16.msra.mxu1 %v2562_v20 }
 0x9a1   :  { %1980 = vmatprep.subr.bf16.mxu1 %v2416_v0 }
 0x9a4   :  { %1981 = vmatpush3.bf16.msra.mxu1 %v2566_v21 }
 0x9a5   :  { %2006 = vmatprep.subr.bf16.mxu1 %v2416_v0 }
 0xa47   :  { %v869_v43 = vpop.f32.mrf.mxu1 }
 0xa48   :  { %v870_v45 = vadd.f32 %v2654_v54, %v869_v43  ;;  %v2960_v43 = vld [vmem:[#allocation8 + $0x10] sm:$0xff]  }
 0xa49   :  { %v1944_v46 = vpop.f32.mrf.mxu1 }
 0xa4a   :  { %v875_v47 = vmul.f32 0.1, %v870_v45  ;;  %v2968_v45 = vld [vmem:[#allocation8] sm:$0xff]  }
 0xa4b   :  { %v872_v49 = vpop.f32.mrf.mxu1 }
 0xa4c   :  { %v2852_v50 = vadd.f32 %v875_v47, %v2787_v55 }
 0xa4d   :  { %v1945_v52 = vpop.f32.mrf.mxu1 }
 0xa4e   :  { %878 = vst [vmem:[#allocation12 + $0x18] sm:$0xff] %v2852_v50  ;;  %v882_v53 = vadd.f32 %v881_v48, %v2852_v50 }
 0xa50   :  { %v883_v56 = vpack.c.bf16 %v882_v53, %v882_v53 }
 0xa52   :  { %1963 = vmatmul.mubr.bf16.vlgmr.msra.gmra.mxu0 %v883_v56 }
 0xa53   :  { %1987 = vmatpush3.bf16.msra.mxu0 %v2571_v22  ;;  %2002 = vmatprep.mubr.msk.bf16.mxu0 %vm2417_vm0, %v2416_v0 }
 0xa54   :  { %1988 = vmatprep.subr.bf16.mxu0 %v2416_v0 }
 0xa57   :  { %1989 = vmatpush3.bf16.msra.mxu0 %v2574_v23 }
 0xa58   :  { %1990 = vmatprep.subr.bf16.mxu0 %v2416_v0 }
 0xa5b   :  { %1991 = vmatpush3.bf16.msra.mxu0 %v2603_v36 }
 0xa5c   :  { %1992 = vmatprep.subr.bf16.mxu0 %v2416_v0 }
 0xa5f   :  { %1993 = vmatpush3.bf16.msra.mxu0 %v2607_v37 }
 0xa60   :  { %1994 = vmatprep.subr.bf16.mxu0 %v2416_v0 }
 0xa63   :  { %1995 = vmatpush3.bf16.msra.mxu0 %v2611_v38 }
 0xa64   :  { %1996 = vmatprep.subr.bf16.mxu0 %v2416_v0 }
 0xa67   :  { %1997 = vmatpush3.bf16.msra.mxu0 %v2615_v39 }
 0xa68   :  { %1998 = vmatprep.subr.bf16.mxu0 %v2416_v0 }
 0xa6b   :  { %1999 = vmatpush3.bf16.msra.mxu0 %v2619_v40 }
 0xa6c   :  { %2000 = vmatprep.subr.bf16.mxu0 %v2416_v0 }
 0xa6f   :  { %2001 = vmatpush3.bf16.msra.mxu0 %v2623_v41 }
 0xa70   :  { %2026 = vmatprep.subr.bf16.mxu0 %v2416_v0 }
 0xb12   :  { %v918_v55 = vpop.f32.mrf.mxu0 }
 0xb13   :  { %v919_v57 = vadd.f32 %v2582_v24, %v918_v55 }
 0xb14   :  { %v1964_v59 = vpop.f32.mrf.mxu0 }
 0xb15   :  { %v925_v51 = vmul.f32 0.70710677, %v919_v57  ;;  %v924_v61 = vmul.f32 0.5, %v919_v57 }
 0xb16   :  { %v921_v58 = vpop.f32.mrf.mxu0 }
 0xb17   :  { %2238 = verf.f32 %v925_v51  ;;  %v2973_v51 = vld [vmem:[#allocation9 + $0x38] sm:$0xff]   ;;  %v2983_v58 = vld [vmem:[#allocation9 + $0x28] sm:$0xff]  }
 0xb18   :  { %v1965_v60 = vpop.f32.mrf.mxu0 }
 0xb19   :  { %v2987_v60 = vld [vmem:[#allocation9 + $0x20] sm:$0xff]  }
 0xb24   :  { %v2239_v62 = vpop.eup %2238 }
 0xb25   :  { %v927_v63 = vadd.f32 1.0, %v2239_v62  ;;  %v2991_v62 = vld [vmem:[#allocation9 + $0x18] sm:$0xff]  }
 0xb27   :  { %v928_v10 = vmul.f32 %v927_v63, %v924_v61  ;;  %v2995_v61 = vld [vmem:[#allocation9 + $0x10] sm:$0xff]   ;;  %v2999_v63 = vld [vmem:[#allocation9 + $0x8] sm:$0xff]  }
 0xb29   :  { %v929_v9 = vpack.c.bf16 %v928_v10, %v928_v10  ;;  %v3003_v10 = vld [vmem:[#allocation9] sm:$0xff]  }
 0xb2b   :  { %1983 = vmatmul.mubr.bf16.vlgmr.msra.gmra.mxu1 %v929_v9 }
 0xb2c   :  { %2007 = vmatpush3.bf16.msra.mxu1 %v2499_v1  ;;  %2022 = vmatprep.mubr.msk.bf16.mxu1 %vm2417_vm0, %v2416_v0 }
 0xb2d   :  { %2008 = vmatprep.subr.bf16.mxu1 %v2416_v0 }
 0xb30   :  { %2009 = vmatpush3.bf16.msra.mxu1 %v2502_v2 }
 0xb31   :  { %2010 = vmatprep.subr.bf16.mxu1 %v2416_v0 }
 0xb34   :  { %2011 = vmatpush3.bf16.msra.mxu1 %v2506_v3 }
 0xb35   :  { %2012 = vmatprep.subr.bf16.mxu1 %v2416_v0 }
 0xb38   :  { %2013 = vmatpush3.bf16.msra.mxu1 %v2512_v5 }
 0xb39   :  { %2014 = vmatprep.subr.bf16.mxu1 %v2416_v0 }
 0xb3c   :  { %2015 = vmatpush3.bf16.msra.mxu1 %v2518_v7 }
 0xb3d   :  { %2016 = vmatprep.subr.bf16.mxu1 %v2416_v0 }
 0xb40   :  { %2017 = vmatpush3.bf16.msra.mxu1 %v2524_v8 }
 0xb41   :  { %2018 = vmatprep.subr.bf16.mxu1 %v2416_v0 }
 0xb44   :  { %2019 = vmatpush3.bf16.msra.mxu1 %v2533_v11 }
 0xb45   :  { %2020 = vmatprep.subr.bf16.mxu1 %v2416_v0 }
 0xb48   :  { %2021 = vmatpush3.bf16.msra.mxu1 %v2540_v14 }
 0xb49   :  { %2046 = vmatprep.subr.bf16.mxu1 %v2416_v0 }
 0xbeb   :  { %v964_v1 = vpop.f32.mrf.mxu1 }
 0xbec   :  { %v965_v2 = vadd.f32 %v2630_v42, %v964_v1  ;;  %v3007_v1 = vld [vmem:[#allocation3 + $0x18] sm:$0xff]  }
 0xbed   :  { %v1984_v3 = vpop.f32.mrf.mxu1 }
 0xbee   :  { %v971_v5 = vmul.f32 0.70710677, %v965_v2  ;;  %v970_v8 = vmul.f32 0.5, %v965_v2 }
 0xbef   :  { %v967_v7 = vpop.f32.mrf.mxu1 }
 0xbf0   :  { %2240 = verf.f32 %v971_v5  ;;  %v1163_v7 = vunpack.c.l.bf16 %v3007_v1 }
 0xbf1   :  { %v1985_v12 = vpop.f32.mrf.mxu1 }
 0xbfd   :  { %v2241_v13 = vpop.eup %2240 }
 0xbfe   :  { %v973_v15 = vadd.f32 1.0, %v2241_v13 }
 0xc00   :  { %v974_v25 = vmul.f32 %v973_v15, %v970_v8 }
 0xc02   :  { %v975_v26 = vpack.c.bf16 %v974_v25, %v974_v25 }
 0xc04   :  { %2003 = vmatmul.mubr.bf16.vlgmr.msra.gmra.mxu0 %v975_v26  ;;  %v3016_v26 = vld [vmem:[#allocation11 + $0x38] sm:$0xff]  }
 0xc05   :  { %2027 = vmatpush3.bf16.msra.mxu0 %v2509_v4  ;;  %2042 = vmatprep.mubr.msk.bf16.mxu0 %vm2417_vm0, %v2416_v0 }
 0xc06   :  { %2028 = vmatprep.subr.bf16.mxu0 %v2416_v0 }
 0xc09   :  { %2029 = vmatpush3.bf16.msra.mxu0 %v2514_v6 }
 0xc0a   :  { %2030 = vmatprep.subr.bf16.mxu0 %v2416_v0 }
 0xc0d   :  { %2031 = vmatpush3.bf16.msra.mxu0 %v2547_v16  ;;  %v1022_v16 = vunpack.c.h.bf16 %v2847_v44  ;;  %v2964_v44 = vld [vmem:[#allocation8 + $0x8] sm:$0xff]  }
 0xc0e   :  { %2032 = vmatprep.subr.bf16.mxu0 %v2416_v0 }
 0xc11   :  { %2033 = vmatpush3.bf16.msra.mxu0 %v2551_v17 }
 0xc12   :  { %2034 = vmatprep.subr.bf16.mxu0 %v2416_v0 }
 0xc15   :  { %2035 = vmatpush3.bf16.msra.mxu0 %v2554_v18 }
 0xc16   :  { %2036 = vmatprep.subr.bf16.mxu0 %v2416_v0 }
 0xc19   :  { %2037 = vmatpush3.bf16.msra.mxu0 %v2558_v19 }
 0xc1a   :  { %2038 = vmatprep.subr.bf16.mxu0 %v2416_v0 }
 0xc1d   :  { %2039 = vmatpush3.bf16.msra.mxu0 %v2562_v20 }
 0xc1e   :  { %2040 = vmatprep.subr.bf16.mxu0 %v2416_v0 }
 0xc21   :  { %2041 = vmatpush3.bf16.msra.mxu0 %v2566_v21 }
 0xc22   :  { %2066 = vmatprep.subr.bf16.mxu0 %v2416_v0 }
 0xcc4   :  { %v1010_v4 = vpop.f32.mrf.mxu0 }
 0xcc5   :  { %v1011_v6 = vadd.f32 %v2654_v54, %v1010_v4  ;;  %v3026_v4 = vld [vmem:[#allocation11 + $0x28] sm:$0xff]  }
 0xcc6   :  { %v2004_v11 = vpop.f32.mrf.mxu0 }
 0xcc7   :  { %v1016_v14 = vmul.f32 0.1, %v1011_v6  ;;  %v3030_v6 = vld [vmem:[#allocation11 + $0x20] sm:$0xff]   ;;  %v3034_v11 = vld [vmem:[#allocation11 + $0x18] sm:$0xff]  }
 0xcc8   :  { %v1013_v17 = vpop.f32.mrf.mxu0 }
 0xcc9   :  { %v2915_v18 = vadd.f32 %v1016_v14, %v2852_v50  ;;  %v3038_v14 = vld [vmem:[#allocation11 + $0x10] sm:$0xff]   ;;  %v3049_v17 = vld [vmem:[%s3121_s3] ss:$0 sm:$0xff] }
 0xcca   :  { %v2005_v19 = vpop.f32.mrf.mxu0 }
 0xccb   :  { %1019 = vst [vmem:[#allocation12 + $0x20] sm:$0xff] %v2915_v18  ;;  %v1023_v20 = vadd.f32 %v1022_v16, %v2915_v18 }
 0xccd   :  { %v1024_v27 = vpack.c.bf16 %v1023_v20, %v1023_v20 }
 0xccf   :  { %2023 = vmatmul.mubr.bf16.vlgmr.msra.gmra.mxu1 %v1024_v27 }
 0xcd0   :  { %2047 = vmatpush3.bf16.msra.mxu1 %v2571_v22  ;;  %2062 = vmatprep.mubr.msk.bf16.mxu1 %vm2417_vm0, %v2416_v0 }
 0xcd1   :  { %2048 = vmatprep.subr.bf16.mxu1 %v2416_v0 }
 0xcd4   :  { %2049 = vmatpush3.bf16.msra.mxu1 %v2574_v23 }
 0xcd5   :  { %2050 = vmatprep.subr.bf16.mxu1 %v2416_v0 }
 0xcd8   :  { %2051 = vmatpush3.bf16.msra.mxu1 %v2603_v36 }
 0xcd9   :  { %2052 = vmatprep.subr.bf16.mxu1 %v2416_v0 }
 0xcdc   :  { %2053 = vmatpush3.bf16.msra.mxu1 %v2607_v37 }
 0xcdd   :  { %2054 = vmatprep.subr.bf16.mxu1 %v2416_v0 }
 0xce0   :  { %2055 = vmatpush3.bf16.msra.mxu1 %v2611_v38 }
 0xce1   :  { %2056 = vmatprep.subr.bf16.mxu1 %v2416_v0 }
 0xce4   :  { %2057 = vmatpush3.bf16.msra.mxu1 %v2615_v39 }
 0xce5   :  { %2058 = vmatprep.subr.bf16.mxu1 %v2416_v0 }
 0xce8   :  { %2059 = vmatpush3.bf16.msra.mxu1 %v2619_v40 }
 0xce9   :  { %2060 = vmatprep.subr.bf16.mxu1 %v2416_v0 }
 0xcec   :  { %2061 = vmatpush3.bf16.msra.mxu1 %v2623_v41 }
 0xced   :  { %2086 = vmatprep.subr.bf16.mxu1 %v2416_v0 }
 0xd8f   :  { %v1059_v21 = vpop.f32.mrf.mxu1 }
 0xd90   :  { %v1060_v22 = vadd.f32 %v2582_v24, %v1059_v21  ;;  %v2944_v24 = vld [vmem:[#allocation8 + $0x30] sm:$0xff]  }
 0xd91   :  { %v2024_v23 = vpop.f32.mrf.mxu1 }
 0xd92   :  { %v1066_v36 = vmul.f32 0.70710677, %v1060_v22  ;;  %v1065_v39 = vmul.f32 0.5, %v1060_v22 }
 0xd93   :  { %v1062_v37 = vpop.f32.mrf.mxu1 }
 0xd94   :  { %2242 = verf.f32 %v1066_v36 }
 0xd95   :  { %v2025_v38 = vpop.f32.mrf.mxu1 }
 0xd96   :  { %v3073_v38 = vld [vmem:[%s3123_s5] ss:$0 sm:$0xff] }
 0xda1   :  { %v2243_v28 = vpop.eup %2242 }
 0xda2   :  { %v1068_v29 = vadd.f32 1.0, %v2243_v28 }
 0xda4   :  { %v1069_v30 = vmul.f32 %v1068_v29, %v1065_v39 }
 0xda6   :  { %v1070_v31 = vpack.c.bf16 %v1069_v30, %v1069_v30 }
 0xda8   :  { %2043 = vmatmul.mubr.bf16.vlgmr.msra.gmra.mxu0 %v1070_v31 }
 0xda9   :  { %2067 = vmatpush3.bf16.msra.mxu0 %v2938_v32  ;;  %2082 = vmatprep.mubr.msk.bf16.mxu0 %vm2417_vm0, %v2416_v0 }
 0xdaa   :  { %2068 = vmatprep.subr.bf16.mxu0 %v2416_v0 }
 0xdad   :  { %2069 = vmatpush3.bf16.msra.mxu0 %v2944_v24 }
 0xdae   :  { %2070 = vmatprep.subr.bf16.mxu0 %v2416_v0 }
 0xdb1   :  { %2071 = vmatpush3.bf16.msra.mxu0 %v2948_v33 }
 0xdb2   :  { %2072 = vmatprep.subr.bf16.mxu0 %v2416_v0 }
 0xdb5   :  { %2073 = vmatpush3.bf16.msra.mxu0 %v2952_v34 }
 0xdb6   :  { %2074 = vmatprep.subr.bf16.mxu0 %v2416_v0 }
 0xdb9   :  { %2075 = vmatpush3.bf16.msra.mxu0 %v2956_v35 }
 0xdba   :  { %2076 = vmatprep.subr.bf16.mxu0 %v2416_v0 }
 0xdbd   :  { %2077 = vmatpush3.bf16.msra.mxu0 %v2960_v43 }
 0xdbe   :  { %2078 = vmatprep.subr.bf16.mxu0 %v2416_v0 }
 0xdc1   :  { %2079 = vmatpush3.bf16.msra.mxu0 %v2964_v44 }
 0xdc2   :  { %2080 = vmatprep.subr.bf16.mxu0 %v2416_v0 }
 0xdc5   :  { %2081 = vmatpush3.bf16.msra.mxu0 %v2968_v45 }
 0xdc6   :  { %2106 = vmatprep.subr.bf16.mxu0 %v2416_v0 }
 0xe68   :  { %v1105_v46 = vpop.f32.mrf.mxu0 }
 0xe69   :  { %v1106_v47 = vadd.f32 %v2630_v42, %v1105_v46  ;;  %v2979_v42 = vld [vmem:[#allocation9 + $0x30] sm:$0xff]  }
 0xe6a   :  { %v2044_v48 = vpop.f32.mrf.mxu0 }
 0xe6b   :  { %v1112_v49 = vmul.f32 0.70710677, %v1106_v47  ;;  %v1111_v56 = vmul.f32 0.5, %v1106_v47  ;;  %v1304_v48 = vunpack.c.h.bf16 %v3007_v1 }
 0xe6c   :  { %v1108_v50 = vpop.f32.mrf.mxu0 }
 0xe6d   :  { %2244 = verf.f32 %v1112_v49 }
 0xe6e   :  { %v2045_v52 = vpop.f32.mrf.mxu0 }
 0xe7a   :  { %v2245_v53 = vpop.eup %2244 }
 0xe7b   :  { %v1114_v55 = vadd.f32 1.0, %v2245_v53 }
 0xe7d   :  { %v1115_v57 = vmul.f32 %v1114_v55, %v1111_v56  ;;  %v2279_v55 = vld [vmem:[#allocation11 + $0x8] sm:$0xff]  }
 0xe7f   :  { %v1116_v59 = vpack.c.bf16 %v1115_v57, %v1115_v57  ;;  %v2280_v57 = vld [vmem:[#allocation11] sm:$0xff]  }
 0xe81   :  { %2063 = vmatmul.mubr.bf16.vlgmr.msra.gmra.mxu1 %v1116_v59 }
 0xe82   :  { %2087 = vmatpush3.bf16.msra.mxu1 %v2973_v51  ;;  %2102 = vmatprep.mubr.msk.bf16.mxu1 %vm2417_vm0, %v2416_v0 }
 0xe83   :  { %2088 = vmatprep.subr.bf16.mxu1 %v2416_v0 }
 0xe86   :  { %2089 = vmatpush3.bf16.msra.mxu1 %v2979_v42 }
 0xe87   :  { %2090 = vmatprep.subr.bf16.mxu1 %v2416_v0 }
 0xe8a   :  { %2091 = vmatpush3.bf16.msra.mxu1 %v2983_v58 }
 0xe8b   :  { %2092 = vmatprep.subr.bf16.mxu1 %v2416_v0 }
 0xe8e   :  { %2093 = vmatpush3.bf16.msra.mxu1 %v2987_v60 }
 0xe8f   :  { %2094 = vmatprep.subr.bf16.mxu1 %v2416_v0 }
 0xe92   :  { %2095 = vmatpush3.bf16.msra.mxu1 %v2991_v62 }
 0xe93   :  { %2096 = vmatprep.subr.bf16.mxu1 %v2416_v0 }
 0xe96   :  { %2097 = vmatpush3.bf16.msra.mxu1 %v2995_v61 }
 0xe97   :  { %2098 = vmatprep.subr.bf16.mxu1 %v2416_v0 }
 0xe9a   :  { %2099 = vmatpush3.bf16.msra.mxu1 %v2999_v63 }
 0xe9b   :  { %2100 = vmatprep.subr.bf16.mxu1 %v2416_v0 }
 0xe9e   :  { %2101 = vmatpush3.bf16.msra.mxu1 %v3003_v10 }
 0xe9f   :  { %2126 = vmatprep.subr.bf16.mxu1 %v2416_v0 }
 0xf41   :  { %v1151_v9 = vpop.f32.mrf.mxu1 }
 0xf42   :  { %v1152_v2 = vadd.f32 %v2654_v54, %v1151_v9  ;;  %v3022_v54 = vld [vmem:[#allocation11 + $0x30] sm:$0xff]  }
 0xf43   :  { %v2064_v3 = vpop.f32.mrf.mxu1 }
 0xf44   :  { %v1157_v5 = vmul.f32 0.1, %v1152_v2 }
 0xf45   :  { %v1154_v12 = vpop.f32.mrf.mxu1 }
 0xf46   :  { %v3012_v13 = vadd.f32 %v1157_v5, %v2915_v18 }
 0xf47   :  { %v2065_v8 = vpop.f32.mrf.mxu1 }
 0xf48   :  { %1160 = vst [vmem:[#allocation12 + $0x28] sm:$0xff] %v3012_v13  ;;  %v1164_v15 = vadd.f32 %v1163_v7, %v3012_v13 }
 0xf4a   :  { %v1165_v25 = vpack.c.bf16 %v1164_v15, %v1164_v15 }
 0xf4c   :  { %2083 = vmatmul.mubr.bf16.vlgmr.msra.gmra.mxu0 %v1165_v25 }
 0xf4d   :  { %2107 = vmatpush3.bf16.msra.mxu0 %v3016_v26  ;;  %2122 = vmatprep.mubr.msk.bf16.mxu0 %vm2417_vm0, %v2416_v0 }
 0xf4e   :  { %2108 = vmatprep.subr.bf16.mxu0 %v2416_v0 }
 0xf51   :  { %2109 = vmatpush3.bf16.msra.mxu0 %v3022_v54 }
 0xf52   :  { %2110 = vmatprep.subr.bf16.mxu0 %v2416_v0 }
 0xf55   :  { %2111 = vmatpush3.bf16.msra.mxu0 %v3026_v4 }
 0xf56   :  { %2112 = vmatprep.subr.bf16.mxu0 %v2416_v0 }
 0xf59   :  { %2113 = vmatpush3.bf16.msra.mxu0 %v3030_v6 }
 0xf5a   :  { %2114 = vmatprep.subr.bf16.mxu0 %v2416_v0 }
 0xf5d   :  { %2115 = vmatpush3.bf16.msra.mxu0 %v3034_v11 }
 0xf5e   :  { %2116 = vmatprep.subr.bf16.mxu0 %v2416_v0 }
 0xf61   :  { %2117 = vmatpush3.bf16.msra.mxu0 %v3038_v14 }
 0xf62   :  { %2118 = vmatprep.subr.bf16.mxu0 %v2416_v0 }
 0xf65   :  { %2119 = vmatpush3.bf16.msra.mxu0 %v2619_v40 }
 0xf66   :  { %2120 = vmatprep.subr.bf16.mxu0 %v2416_v0 }
 0xf69   :  { %2121 = vmatpush3.bf16.msra.mxu0 %v2623_v41 }
 0xf6a   :  { %2146 = vmatprep.subr.bf16.mxu0 %v2416_v0 }
0x100c   :  { %v1200_v16 = vpop.f32.mrf.mxu0 }
0x100d   :  { %v1201_v18 = vadd.f32 %v3049_v17, %v1200_v16 }
0x100e   :  { %v2084_v19 = vpop.f32.mrf.mxu0 }
0x100f   :  { %v1207_v20 = vmul.f32 0.70710677, %v1201_v18  ;;  %v1206_v22 = vmul.f32 0.5, %v1201_v18 }
0x1010   :  { %v1203_v27 = vpop.f32.mrf.mxu0 }
0x1011   :  { %2246 = verf.f32 %v1207_v20 }
0x1012   :  { %v2085_v21 = vpop.f32.mrf.mxu0 }
0x101e   :  { %v2247_v40 = vpop.eup %2246 }
0x101f   :  { %v1209_v23 = vadd.f32 1.0, %v2247_v40 }
0x1021   :  { %v1210_v36 = vmul.f32 %v1209_v23, %v1206_v22 }
0x1023   :  { %v1211_v41 = vpack.c.bf16 %v1210_v36, %v1210_v36 }
0x1025   :  { %2103 = vmatmul.mubr.bf16.vlgmr.msra.gmra.mxu1 %v1211_v41 }
0x1026   :  { %2127 = vmatpush3.bf16.msra.mxu1 %v2938_v32  ;;  %2142 = vmatprep.mubr.msk.bf16.mxu1 %vm2417_vm0, %v2416_v0 }
0x1027   :  { %2128 = vmatprep.subr.bf16.mxu1 %v2416_v0 }
0x102a   :  { %2129 = vmatpush3.bf16.msra.mxu1 %v2944_v24 }
0x102b   :  { %2130 = vmatprep.subr.bf16.mxu1 %v2416_v0 }
0x102e   :  { %2131 = vmatpush3.bf16.msra.mxu1 %v2948_v33 }
0x102f   :  { %2132 = vmatprep.subr.bf16.mxu1 %v2416_v0 }
0x1032   :  { %2133 = vmatpush3.bf16.msra.mxu1 %v2952_v34 }
0x1033   :  { %2134 = vmatprep.subr.bf16.mxu1 %v2416_v0 }
0x1036   :  { %2135 = vmatpush3.bf16.msra.mxu1 %v2956_v35 }
0x1037   :  { %2136 = vmatprep.subr.bf16.mxu1 %v2416_v0 }
0x103a   :  { %2137 = vmatpush3.bf16.msra.mxu1 %v2960_v43 }
0x103b   :  { %2138 = vmatprep.subr.bf16.mxu1 %v2416_v0 }
0x103e   :  { %2139 = vmatpush3.bf16.msra.mxu1 %v2964_v44  ;;  %v2278_v44 = vld [vmem:[%s3125_s7] ss:$0 sm:$0xff]  ;;  %s2418_s7 = smov [#allocation12]  }
0x103f   :  { %2140 = vmatprep.subr.bf16.mxu1 %v2416_v0  ;;  %s1449_s15 = sshll.u32 %s2418_s7, 4  ;;  %s1450_s15 = int_to_ptr.vmem [resolvable:$true] %s1449_s15 }
0x1040   :  { %s2381_s16 = scalar_lea.vmem %s1450_s15, 1024  ;;  %p2386_p12 = scmp.lt.s32.totalorder %s1450_s15, %s1450_s15 }
0x1041   :  { %p2382_p11 = scmp.ne.s32.totalorder %s1450_s15, %s2381_s16  ;;  %p2387_p13 = scmp.lt.s32.totalorder %s2381_s16, %s2381_s16 }
0x1042   :  { %2141 = vmatpush3.bf16.msra.mxu1 %v2968_v45 }
0x1043   :  { %2166 = vmatprep.subr.bf16.mxu1 %v2416_v0  ;;  %p2388_p0 = por %p2387_p13, %p2386_p12 }
0x1045   :  { %p2389_p1 = pnand %p2388_p0, %p2382_p11 }
0x10e5   :  { %v1246_v37 = vpop.f32.mrf.mxu1 }
0x10e6   :  { %v1247_v28 = vadd.f32 %v3073_v38, %v1246_v37 }
0x10e7   :  { %v2104_v39 = vpop.f32.mrf.mxu1 }
0x10e8   :  { %v1253_v29 = vmul.f32 0.70710677, %v1247_v28  ;;  %v1252_v24 = vmul.f32 0.5, %v1247_v28 }
0x10e9   :  { %v1249_v30 = vpop.f32.mrf.mxu1 }
0x10ea   :  { %2248 = verf.f32 %v1253_v29 }
0x10eb   :  { %v2105_v31 = vpop.f32.mrf.mxu1 }
0x10f7   :  { %v2249_v32 = vpop.eup %2248 }
0x10f8   :  { %v1255_v33 = vadd.f32 1.0, %v2249_v32 }
0x10fa   :  { %v1256_v34 = vmul.f32 %v1255_v33, %v1252_v24 }
0x10fc   :  { %v1257_v35 = vpack.c.bf16 %v1256_v34, %v1256_v34 }
0x10fe   :  { %2123 = vmatmul.mubr.bf16.vlgmr.msra.gmra.mxu0 %v1257_v35 }
0x10ff   :  { %2147 = vmatpush3.bf16.msra.mxu0 %v2973_v51  ;;  %2162 = vmatprep.mubr.msk.bf16.mxu0 %vm2417_vm0, %v2416_v0 }
0x1100   :  { %2148 = vmatprep.subr.bf16.mxu0 %v2416_v0 }
0x1103   :  { %2149 = vmatpush3.bf16.msra.mxu0 %v2979_v42 }
0x1104   :  { %2150 = vmatprep.subr.bf16.mxu0 %v2416_v0 }
0x1107   :  { %2151 = vmatpush3.bf16.msra.mxu0 %v2983_v58 }
0x1108   :  { %2152 = vmatprep.subr.bf16.mxu0 %v2416_v0 }
0x110b   :  { %2153 = vmatpush3.bf16.msra.mxu0 %v2987_v60 }
0x110c   :  { %2154 = vmatprep.subr.bf16.mxu0 %v2416_v0 }
0x110f   :  { %2155 = vmatpush3.bf16.msra.mxu0 %v2991_v62 }
0x1110   :  { %2156 = vmatprep.subr.bf16.mxu0 %v2416_v0 }
0x1113   :  { %2157 = vmatpush3.bf16.msra.mxu0 %v2995_v61 }
0x1114   :  { %2158 = vmatprep.subr.bf16.mxu0 %v2416_v0 }
0x1117   :  { %2159 = vmatpush3.bf16.msra.mxu0 %v2999_v63 }
0x1118   :  { %2160 = vmatprep.subr.bf16.mxu0 %v2416_v0 }
0x111b   :  { %2161 = vmatpush3.bf16.msra.mxu0 %v3003_v10 }
0x11be   :  { %v1292_v43 = vpop.f32.mrf.mxu0 }
0x11bf   :  { %v1293_v45 = vadd.f32 %v2278_v44, %v1292_v43 }
0x11c0   :  { %v2124_v46 = vpop.f32.mrf.mxu0 }
0x11c1   :  { %v1298_v47 = vmul.f32 0.1, %v1293_v45 }
0x11c2   :  { %v1295_v49 = vpop.f32.mrf.mxu0 }
0x11c3   :  { %v1299_v50 = vadd.f32 %v1298_v47, %v3012_v13 }
0x11c4   :  { %v2125_v52 = vpop.f32.mrf.mxu0 }
0x11c5   :  { %1301 = vst [vmem:[#allocation12 + $0x30] sm:$0xff] %v1299_v50  ;;  %v1305_v53 = vadd.f32 %v1304_v48, %v1299_v50 }
0x11c7   :  { %v1306_v56 = vpack.c.bf16 %v1305_v53, %v1305_v53 }
0x11c9   :  { %2143 = vmatmul.mubr.bf16.vlgmr.msra.gmra.mxu1 %v1306_v56 }
0x11ca   :  { %2167 = vmatpush3.bf16.msra.mxu1 %v3016_v26  ;;  %2182 = vmatprep.mubr.msk.bf16.mxu1 %vm2417_vm0, %v2416_v0 }
0x11cb   :  { %2168 = vmatprep.subr.bf16.mxu1 %v2416_v0 }
0x11ce   :  { %2169 = vmatpush3.bf16.msra.mxu1 %v3022_v54 }
0x11cf   :  { %2170 = vmatprep.subr.bf16.mxu1 %v2416_v0 }
0x11d2   :  { %2171 = vmatpush3.bf16.msra.mxu1 %v3026_v4 }
0x11d3   :  { %2172 = vmatprep.subr.bf16.mxu1 %v2416_v0 }
0x11d6   :  { %2173 = vmatpush3.bf16.msra.mxu1 %v3030_v6 }
0x11d7   :  { %2174 = vmatprep.subr.bf16.mxu1 %v2416_v0 }
0x11da   :  { %2175 = vmatpush3.bf16.msra.mxu1 %v3034_v11 }
0x11db   :  { %2176 = vmatprep.subr.bf16.mxu1 %v2416_v0 }
0x11de   :  { %2177 = vmatpush3.bf16.msra.mxu1 %v3038_v14 }
0x11df   :  { %2178 = vmatprep.subr.bf16.mxu1 %v2416_v0 }
0x11e2   :  { %2179 = vmatpush3.bf16.msra.mxu1 %v2279_v55 }
0x11e3   :  { %2180 = vmatprep.subr.bf16.mxu1 %v2416_v0 }
0x11e6   :  { %2181 = vmatpush3.bf16.msra.mxu1 %v2280_v57 }
0x1289   :  { %v1341_v59 = vpop.f32.mrf.mxu1 }
0x128a   :  { %v1342_v51 = vadd.f32 %v3049_v17, %v1341_v59 }
0x128b   :  { %v2144_v42 = vpop.f32.mrf.mxu1 }
0x128c   :  { %v1348_v58 = vmul.f32 0.70710677, %v1342_v51  ;;  %v1347_v63 = vmul.f32 0.5, %v1342_v51 }
0x128d   :  { %v1344_v60 = vpop.f32.mrf.mxu1 }
0x128e   :  { %2250 = verf.f32 %v1348_v58 }
0x128f   :  { %v2145_v62 = vpop.f32.mrf.mxu1 }
0x129b   :  { %v2251_v61 = vpop.eup %2250 }
0x129c   :  { %v1350_v10 = vadd.f32 1.0, %v2251_v61 }
0x129e   :  { %v1351_v9 = vmul.f32 %v1350_v10, %v1347_v63 }
0x12a0   :  { %v1352_v1 = vpack.c.bf16 %v1351_v9, %v1351_v9 }
0x12a2   :  { %2163 = vmatmul.mubr.bf16.vlgmr.msra.gmra.mxu0 %v1352_v1 }
0x1362   :  { %v1387_v2 = vpop.f32.mrf.mxu0 }
0x1363   :  { %v1388_v3 = vadd.f32 %v3073_v38, %v1387_v2 }
0x1364   :  { %v2164_v0 = vpop.f32.mrf.mxu0 }
0x1365   :  { %v1394_v5 = vmul.f32 0.70710677, %v1388_v3  ;;  %v1393_v8 = vmul.f32 0.5, %v1388_v3 }
0x1366   :  { %v1390_v7 = vpop.f32.mrf.mxu0 }
0x1367   :  { %2252 = verf.f32 %v1394_v5 }
0x1368   :  { %v2165_v12 = vpop.f32.mrf.mxu0 }
0x1374   :  { %v2253_v13 = vpop.eup %2252 }
0x1375   :  { %v1396_v15 = vadd.f32 1.0, %v2253_v13 }
0x1377   :  { %v1397_v25 = vmul.f32 %v1396_v15, %v1393_v8 }
0x1379   :  { %v1398_v26 = vpack.c.bf16 %v1397_v25, %v1397_v25 }
0x137b   :  { %2183 = vmatmul.mubr.bf16.vlgmr.msra.gmra.mxu1 %v1398_v26 }
0x143b   :  { %v1433_v54 = vpop.f32.mrf.mxu1 }
0x143c   :  { %v1434_v4 = vadd.f32 %v2278_v44, %v1433_v54 }
0x143d   :  { %v2184_v6 = vpop.f32.mrf.mxu1 }
0x143e   :  { %v1439_v11 = vmul.f32 0.1, %v1434_v4 }
0x143f   :  { %v1436_v14 = vpop.f32.mrf.mxu1 }
0x1440   :  { %v1440_v16 = vadd.f32 %v1439_v11, %v1299_v50 }
0x1441   :  { %v2185_v17 = vpop.f32.mrf.mxu1 }
0x1442   :  { %1442 = vst [vmem:[#allocation12 + $0x38] sm:$0xff] %v1440_v16 }
0x1443   :  { %2392 = shalt.err (!%p2389_p1)
}
0x1444   :  { %s2419_s17 = smov 128   ;;  %s2420_s18 = smov 8  }
0x1445   :  { %1455 = dma.vmem_to_hbm [thread:$0]  %s1450_s15, 1024, %s3126_s8, [#allocation5], %s2419_s17, %s2419_s17, %s2420_s18  }
0x1446   :  { %2407 = dma.done.wait [#allocation5], 1024  }
0x1447   :  { %2408 = vsyncadd [#allocation5], 4294966272 }
0x1448   :  { %1459 = vsyncpa [#allocation4], 1 }
0x1449   :  { %1460 = vsyncpa [#allocation7], 1 }
0x144a   :  { %1461 = vsyncpa [#allocation10], 1 }
0x144b   :  { %1462 = vsyncpa [#allocation5], 1 }

</bundles_post_ra>
